<compile_context>
chip_gen: v5e
topology: v5e:2x2
jax: 0.10.0
libtpu: 0.0.40
codegen_flags: <defaults>
</compile_context>

<pallas_src>
import functools

import jax
import jax.numpy as jnp
import numpy as np
from jax.experimental import pallas as pl
from jax.experimental.pallas import tpu as pltpu


# ------------------------------------------------------------------ math utils

_ERF_P = 0.3275911
_ERF_A = (0.254829592, -0.284496736, 1.421413741, -1.453152027, 1.061405429)


def _erf(x):
    # Abramowitz & Stegun 7.1.26 polynomial erf (abs error ~1.5e-7 in f32).
    s = jnp.where(x >= 0.0, 1.0, -1.0)
    a = jnp.abs(x)
    t = 1.0 / (1.0 + _ERF_P * a)
    poly = t * (_ERF_A[0] + t * (_ERF_A[1] + t * (_ERF_A[2] + t * (_ERF_A[3] + t * _ERF_A[4]))))
    return s * (1.0 - poly * jnp.exp(-a * a))


def _gelu(x):
    # exact (erf-based) GELU, matching F.gelu(..., approximate='none'); kept f32.
    return 0.5 * x * (1.0 + _erf(x * (1.0 / np.sqrt(2.0))))


def _layernorm(x, w, b, eps=1e-5):
    m = jnp.mean(x, axis=-1, keepdims=True)
    v = jnp.mean(jnp.square(x - m), axis=-1, keepdims=True)
    return (x - m) * jax.lax.rsqrt(v + eps) * w + b


# ------------------------------------------------------------------ stem kernel
# grid = (B,); one batch element per step.  Wrapper provides the padded mel
# input deinterleaved into even/odd time phases so both convolutions are pure
# per-tap accumulating matmuls (no lane-axis concat, no strided loads).


def _stem_kernel(xe_ref, xo_ref, c1w_ref, c1b_ref, c2w_ref, c2b_ref, pos_ref, o_ref):
    bf16, f32 = jnp.bfloat16, jnp.float32
    t_seq, d = o_ref.shape[1], o_ref.shape[2]

    xe = xe_ref[0].astype(bf16)          # (T_seq+1, M): xpad rows 0,2,4,...
    xo = xo_ref[0].astype(bf16)          # (T_seq+1, M): xpad rows 1,3,5,...

    # conv1 (k=3, s=1, p=1), computed on its even / odd output phases:
    #   h1[2j]   = w0*xpad[2j]   + w1*xpad[2j+1] + w2*xpad[2j+2]
    #   h1[2j+1] = w0*xpad[2j+1] + w1*xpad[2j+2] + w2*xpad[2j+3]
    h1e = (jnp.dot(xe[:t_seq], c1w_ref[0], preferred_element_type=f32)
           + jnp.dot(xo[:t_seq], c1w_ref[1], preferred_element_type=f32)
           + jnp.dot(xe[1:t_seq + 1], c1w_ref[2], preferred_element_type=f32)
           + c1b_ref[...])
    h1o = (jnp.dot(xo[:t_seq], c1w_ref[0], preferred_element_type=f32)
           + jnp.dot(xe[1:t_seq + 1], c1w_ref[1], preferred_element_type=f32)
           + jnp.dot(xo[1:t_seq + 1], c1w_ref[2], preferred_element_type=f32)
           + c1b_ref[...])
    g1e = _gelu(h1e).astype(bf16)        # gelu(conv1) rows 2j
    g1o = _gelu(h1o).astype(bf16)        # gelu(conv1) rows 2j+1

    # conv2 (k=3, s=2, p=1): out[j] = w0*g1[2j-1] + w1*g1[2j] + w2*g1[2j+1]
    base = (jnp.dot(g1e, c2w_ref[1], preferred_element_type=f32)
            + jnp.dot(g1o, c2w_ref[2], preferred_element_type=f32)
            + c2b_ref[...])
    left = jnp.dot(g1o, c2w_ref[0], preferred_element_type=f32)   # row j -> out row j+1

    # row 0 has zero left-tap contribution (conv2 padding); rows 1.. add it.
    o_ref[0, 0:1, :] = _gelu(base[0:1, :]) + pos_ref[0:1, :]
    o_ref[0, 1:t_seq, :] = (_gelu(base[1:t_seq, :] + left[0:t_seq - 1, :])
                            + pos_ref[1:t_seq, :])


# ------------------------------------------------------------------ layer kernel
# grid = (L,); per-layer stacked weights DMA behind compute, residual stream
# stays resident in a VMEM scratch across the whole grid.


def _layers_kernel(
    x0_ref,                                          # (N, D) f32  stem output
    ln1w_ref, ln1b_ref,                              # (1, 1, D) f32
    wqkv_ref, bqkv_ref,                              # (1, D, 3D) bf16 / (1, 1, 3D) f32
    wo_ref, bo_ref,                                  # (1, D, D) bf16 / (1, 1, D) f32
    ln2w_ref, ln2b_ref,                              # (1, 1, D) f32
    w1_ref, b1_ref, w2_ref, b2_ref,                  # MLP weights
    lnpw_ref, lnpb_ref,                              # (1, D) f32  final LayerNorm
    o_ref,                                           # (N, D) f32
    x_sc,                                            # VMEM (N, D) f32  residual stream
    ctx_sc,                                          # VMEM (N, D) bf16 attention context
    *, n_b, t_seq, n_head,
):
    l = pl.program_id(0)
    bf16, f32 = jnp.bfloat16, jnp.float32
    n_rows, d = o_ref.shape
    head_dim = d // n_head

    @pl.when(l == 0)
    def _init():
        x_sc[...] = x0_ref[...]

    x = x_sc[...]                                    # (N, D) f32

    # ---------------- self-attention branch
    h = _layernorm(x, ln1w_ref[0], ln1b_ref[0]).astype(bf16)
    qkv = jnp.dot(h, wqkv_ref[0], preferred_element_type=f32) + bqkv_ref[0]   # (N, 3D)
    # single full-width bf16 cast per tensor (no per-head casts)
    q = qkv[:, 0:d].astype(bf16).reshape(n_b, t_seq, d)
    k = qkv[:, d:2 * d].astype(bf16).reshape(n_b, t_seq, d)
    v = qkv[:, 2 * d:3 * d].astype(bf16).reshape(n_b, t_seq, d)

    for hh in range(n_head):
        sl = slice(hh * head_dim, (hh + 1) * head_dim)
        s = jnp.einsum("bqd,bkd->bqk", q[..., sl], k[..., sl],
                       preferred_element_type=f32)
        s = s - jnp.max(s, axis=-1, keepdims=True)
        p = jnp.exp(s)
        p = p * pl.reciprocal(jnp.sum(p, axis=-1, keepdims=True), approx=True)
        oh = jnp.einsum("bqk,bkd->bqd", p.astype(bf16), v[..., sl],
                        preferred_element_type=f32)
        # static column store into the lane-contiguous bf16 context scratch
        ctx_sc[:, hh * head_dim:(hh + 1) * head_dim] = (
            oh.reshape(n_rows, head_dim).astype(bf16))

    # ONE full-K output projection instead of H per-head K=head_dim dots.
    x = x + jnp.dot(ctx_sc[...], wo_ref[0], preferred_element_type=f32) + bo_ref[0]

    # ---------------- MLP branch
    h2 = _layernorm(x, ln2w_ref[0], ln2b_ref[0]).astype(bf16)
    hid = _gelu(jnp.dot(h2, w1_ref[0], preferred_element_type=f32) + b1_ref[0]).astype(bf16)
    x = x + jnp.dot(hid, w2_ref[0], preferred_element_type=f32) + b2_ref[0]
    x_sc[...] = x

    # ---------------- final LayerNorm on the last layer only
    @pl.when(l == pl.num_programs(0) - 1)
    def _post():
        o_ref[...] = _layernorm(x_sc[...], lnpw_ref[...], lnpb_ref[...])


# ------------------------------------------------------------------ parameters


def init_params(key, dims):
    D = dims["n_audio_state"]
    M = dims["n_mels"]
    L = dims["n_audio_layer"]
    CTX = dims["n_audio_ctx"]

    keys = iter(jax.random.split(key, 8 + 16 * L))

    def nrm(shape, std=0.02):
        return std * jax.random.normal(next(keys), shape, jnp.float32)

    p = {
        "conv1_w": nrm((3, M, D)),        # (tap, in, out)
        "conv1_b": nrm((1, D)),
        "conv2_w": nrm((3, D, D)),
        "conv2_b": nrm((1, D)),
        "pos": 0.01 * jax.random.normal(next(keys), (CTX, D), jnp.float32),
        "ln_post_w": 1.0 + nrm((1, D), 0.01),
        "ln_post_b": nrm((1, D), 0.01),
        "blocks": [],
    }
    for _ in range(L):
        p["blocks"].append(
            {
                "ln1_w": 1.0 + nrm((1, D), 0.01),
                "ln1_b": nrm((1, D), 0.01),
                "wq": nrm((D, D)), "bq": nrm((1, D)),
                "wk": nrm((D, D)),
                "wv": nrm((D, D)), "bv": nrm((1, D)),
                "wo": nrm((D, D)), "bo": nrm((1, D)),
                "ln2_w": 1.0 + nrm((1, D), 0.01),
                "ln2_b": nrm((1, D), 0.01),
                "w1": nrm((D, 4 * D)), "b1": nrm((1, 4 * D)),
                "w2": nrm((4 * D, D)), "b2": nrm((1, D)),
            }
        )
    return p


def _stack_layer_params(params, dims):
    """Stack per-layer weights along a leading L axis; fuse Q/K/V into one
    (D, 3D) matmul (1/sqrt(head_dim) folded into the Q section), bf16 matmul
    weights, f32 biases/LN params."""
    D = dims["n_audio_state"]
    H = dims["n_audio_head"]
    hd = D // H
    bf16 = jnp.bfloat16
    scale = 1.0 / np.sqrt(hd)
    blocks = params["blocks"]

    def stack(name, dtype=None):
        out = jnp.stack([blk[name] for blk in blocks], axis=0)
        return out.astype(dtype) if dtype is not None else out

    wq = jnp.stack([blk["wq"] * scale for blk in blocks], axis=0)
    wqkv = jnp.concatenate([wq, stack("wk"), stack("wv")], axis=-1).astype(bf16)
    bq = jnp.stack([blk["bq"] * scale for blk in blocks], axis=0)
    bqkv = jnp.concatenate([bq, jnp.zeros_like(bq), stack("bv")], axis=-1)  # no key bias

    return {
        "ln1w": stack("ln1_w"), "ln1b": stack("ln1_b"),
        "wqkv": wqkv,                       # (L, D, 3D) bf16
        "bqkv": bqkv,                       # (L, 1, 3D) f32
        "wo": stack("wo", bf16), "bo": stack("bo"),
        "ln2w": stack("ln2_w"), "ln2b": stack("ln2_b"),
        "w1": stack("w1", bf16), "b1": stack("b1"),
        "w2": stack("w2", bf16), "b2": stack("b2"),
    }


def _prep_stem(params, x_nct, dims):
    """Wrapper-side prep: channels-last, pad time by 1, deinterleave the padded
    input into even/odd phases for the fused stride-1/stride-2 conv stem."""
    B, M, T_in = x_nct.shape
    assert T_in % 2 == 0, "stem assumes an even input length (Whisper uses 3000)"
    x = jnp.transpose(x_nct, (0, 2, 1)).astype(jnp.float32)        # (B, T_in, M)
    xpad = jnp.pad(x, ((0, 0), (1, 1), (0, 0)))                    # (B, T_in+2, M)

    T2 = (T_in + 2 - 3) // 2 + 1
    T_seq = min(T2, dims["n_audio_ctx"])

    xE = xpad[:, 0::2, :][:, :T_seq + 1, :]                        # xpad rows 0,2,...
    xO = xpad[:, 1::2, :][:, :T_seq + 1, :]                        # xpad rows 1,3,...
    c1w = params["conv1_w"].astype(jnp.bfloat16)                   # (3, M, D)
    c2w = params["conv2_w"].astype(jnp.bfloat16)                   # (3, D, D)
    pos = params["pos"][:T_seq]                                    # (T_seq, D) — not batch-tiled
    return xE, xO, c1w, c2w, pos, T_seq


# ------------------------------------------------------------------ forward


def _stem_forward(params, x_nct, dims):
    D = dims["n_audio_state"]
    M = dims["n_mels"]
    xE, xO, c1w, c2w, pos, T_seq = _prep_stem(params, x_nct, dims)
    B = xE.shape[0]
    TP = T_seq + 1

    out = pl.pallas_call(
        _stem_kernel,
        out_shape=jax.ShapeDtypeStruct((B, T_seq, D), jnp.float32),
        grid_spec=pltpu.PrefetchScalarGridSpec(
            num_scalar_prefetch=0,
            grid=(B,),
            in_specs=[
                pl.BlockSpec((1, TP, M), lambda b: (b, 0, 0)),
                pl.BlockSpec((1, TP, M), lambda b: (b, 0, 0)),
                pl.BlockSpec((3, M, D), lambda b: (0, 0, 0)),
                pl.BlockSpec((1, D), lambda b: (0, 0)),
                pl.BlockSpec((3, D, D), lambda b: (0, 0, 0)),
                pl.BlockSpec((1, D), lambda b: (0, 0)),
                pl.BlockSpec((T_seq, D), lambda b: (0, 0)),
            ],
            out_specs=pl.BlockSpec((1, T_seq, D), lambda b: (b, 0, 0)),
        ),
        compiler_params=pltpu.CompilerParams(dimension_semantics=("parallel",)),
    )(xE, xO, c1w, params["conv1_b"], c2w, params["conv2_b"], pos)
    return out.reshape(B * T_seq, D), T_seq


def audio_encoder_forward(params, x_nct, dims):
    B = x_nct.shape[0]
    D = dims["n_audio_state"]
    H = dims["n_audio_head"]
    L = dims["n_audio_layer"]

    x0, T_seq = _stem_forward(params, x_nct, dims)                 # (N, D) f32
    N = B * T_seq
    stk = _stack_layer_params(params, dims)

    layer_ops = [stk["ln1w"], stk["ln1b"], stk["wqkv"], stk["bqkv"], stk["wo"],
                 stk["bo"], stk["ln2w"], stk["ln2b"], stk["w1"], stk["b1"],
                 stk["w2"], stk["b2"]]
    tail_ops = [params["ln_post_w"], params["ln_post_b"]]
    operands = [x0] + layer_ops + tail_ops

    def _const_spec(a):
        nd = a.ndim
        return pl.BlockSpec(a.shape, lambda l, _n=nd: (0,) * _n)

    def _layer_spec(a):
        nd = a.ndim
        return pl.BlockSpec((1,) + tuple(a.shape[1:]),
                            lambda l, _n=nd: (l,) + (0,) * (_n - 1))

    in_specs = ([_const_spec(x0)]
                + [_layer_spec(a) for a in layer_ops]
                + [_const_spec(a) for a in tail_ops])

    kernel = functools.partial(_layers_kernel, n_b=B, t_seq=T_seq, n_head=H)

    out = pl.pallas_call(
        kernel,
        out_shape=jax.ShapeDtypeStruct((N, D), jnp.float32),
        grid_spec=pltpu.PrefetchScalarGridSpec(
            num_scalar_prefetch=0,
            grid=(L,),
            in_specs=in_specs,
            out_specs=pl.BlockSpec((N, D), lambda l: (0, 0)),      # resident across layers
            scratch_shapes=[pltpu.VMEM((N, D), jnp.float32),       # residual stream
                            pltpu.VMEM((N, D), jnp.bfloat16)],     # attention context
        ),
        compiler_params=pltpu.CompilerParams(
            dimension_semantics=("arbitrary",),
        ),
    )(*operands)
    return out.reshape(B, T_seq, D)


# ------------------------------------------------------------------ pure-JAX reference
# Mirrors the kernel's mixed-precision recipe (bf16 MXU feeds, f32 accumulation,
# f32 LayerNorm/softmax/GELU), so the comparison isolates the Pallas path.


def reference_forward(params, x_nct, dims):
    B, M, T_in = x_nct.shape
    D = dims["n_audio_state"]
    H = dims["n_audio_head"]
    hd = D // H
    L = dims["n_audio_layer"]
    bf16, f32 = jnp.bfloat16, jnp.float32

    stk = _stack_layer_params(params, dims)
    x = jnp.transpose(x_nct, (0, 2, 1)).astype(f32)
    xpad = jnp.pad(x, ((0, 0), (1, 1), (0, 0)))
    T2 = (T_in + 2 - 3) // 2 + 1
    T_seq = min(T2, dims["n_audio_ctx"])
    N = B * T_seq

    c1w = params["conv1_w"].astype(bf16)
    c2w = params["conv2_w"].astype(bf16)

    # conv1 (stride 1, pad 1) per-tap + GELU
    h1 = jnp.zeros((B, T_in, D), f32)
    for kk in range(3):
        h1 = h1 + jnp.einsum("btm,md->btd", xpad[:, kk:kk + T_in, :].astype(bf16),
                             c1w[kk], preferred_element_type=f32)
    g1 = _gelu(h1 + params["conv1_b"]).astype(bf16)

    # conv2 (stride 2, pad 1) per-tap + GELU + positional embedding
    g1p = jnp.pad(g1, ((0, 0), (1, 1), (0, 0)))
    h2 = jnp.zeros((B, T_seq, D), f32)
    for kk in range(3):
        win = g1p[:, kk:kk + 2 * T_seq:2, :][:, :T_seq, :]
        h2 = h2 + jnp.einsum("btd,de->bte", win, c2w[kk], preferred_element_type=f32)
    xx = (_gelu(h2 + params["conv2_b"]) + params["pos"][:T_seq][None]).reshape(N, D)

    for l in range(L):
        h = _layernorm(xx, stk["ln1w"][l], stk["ln1b"][l]).astype(bf16)
        qkv = jnp.dot(h, stk["wqkv"][l], preferred_element_type=f32) + stk["bqkv"][l]
        q = qkv[:, 0:D].astype(bf16).reshape(B, T_seq, H, hd).transpose(0, 2, 1, 3)
        k = qkv[:, D:2 * D].astype(bf16).reshape(B, T_seq, H, hd).transpose(0, 2, 1, 3)
        v = qkv[:, 2 * D:3 * D].astype(bf16).reshape(B, T_seq, H, hd).transpose(0, 2, 1, 3)
        s = jnp.einsum("bhqd,bhkd->bhqk", q, k, preferred_element_type=f32)
        s = s - jnp.max(s, axis=-1, keepdims=True)
        p = jnp.exp(s)
        p = p / jnp.sum(p, axis=-1, keepdims=True)
        o = jnp.einsum("bhqk,bhkd->bhqd", p.astype(bf16), v, preferred_element_type=f32)
        o = o.transpose(0, 2, 1, 3).reshape(N, D).astype(bf16)
        xx = xx + jnp.dot(o, stk["wo"][l], preferred_element_type=f32) + stk["bo"][l]
        h2_ = _layernorm(xx, stk["ln2w"][l], stk["ln2b"][l]).astype(bf16)
        hid = _gelu(jnp.dot(h2_, stk["w1"][l], preferred_element_type=f32)
                    + stk["b1"][l]).astype(bf16)
        xx = xx + jnp.dot(hid, stk["w2"][l], preferred_element_type=f32) + stk["b2"][l]

    xx = _layernorm(xx, params["ln_post_w"], params["ln_post_b"])
    return xx.reshape(B, T_seq, D)


# ------------------------------------------------------------------ main


if __name__ == "__main__":
    dims = dict(
        n_mels=8,
        n_audio_ctx=8,
        n_audio_state=32,
        n_audio_head=4,
        n_audio_layer=2,
    )
    key = jax.random.PRNGKey(0)
    pkey, xkey = jax.random.split(key)
    params = init_params(pkey, dims)

    # Input follows the PyTorch NCW convention: (batch, n_mels, time).
    x = jax.random.normal(xkey, (2, dims["n_mels"], 16), jnp.float32)

    fwd = jax.jit(lambda p, inp: audio_encoder_forward(p, inp, dims))
    out = jax.block_until_ready(fwd(params, x))

    assert out.shape == (2, dims["n_audio_ctx"], dims["n_audio_state"])
    ref = jax.block_until_ready(reference_forward(params, x, dims))
    # Remaining differences vs. the mirrored-precision reference: f32
    # accumulation order and the approx. reciprocal in softmax normalisation.
    np.testing.assert_allclose(np.asarray(out), np.asarray(ref), rtol=5e-3, atol=5e-3)
    print("KERNEL_OK")
</pallas_src>

<mosaic_0001>
module attributes {stable_mosaic.version = 11 : i64} {
  func.func @_stem_kernel(%arg0: i32, %arg1: memref<1x9x8xf32, #tpu.memory_space<vmem>>, %arg2: memref<1x9x8xf32, #tpu.memory_space<vmem>>, %arg3: memref<3x8x32xbf16, #tpu.memory_space<vmem>>, %arg4: memref<1x32xf32, #tpu.memory_space<vmem>>, %arg5: memref<3x32x32xbf16, #tpu.memory_space<vmem>>, %arg6: memref<1x32xf32, #tpu.memory_space<vmem>>, %arg7: memref<8x32xf32, #tpu.memory_space<vmem>>, %arg8: memref<1x8x32xf32, #tpu.memory_space<vmem>>) attributes {dimension_semantics = [#tpu.dimension_semantics<parallel>], iteration_bounds = array<i64: 2>, scalar_prefetch = 0 : i64, scratch_operands = 0 : i64, tpu.core_type = #tpu.core_type<tc>, window_params = [{transform_indices = @transform_0, window_bounds = array<i64: 1, 9, 8>}, {transform_indices = @transform_1, window_bounds = array<i64: 1, 9, 8>}, {pipeline_mode = #tpu.pipeline_mode<synchronous>, transform_indices = @transform_2, window_bounds = array<i64: 3, 8, 32>}, {pipeline_mode = #tpu.pipeline_mode<synchronous>, transform_indices = @transform_3, window_bounds = array<i64: 1, 32>}, {pipeline_mode = #tpu.pipeline_mode<synchronous>, transform_indices = @transform_4, window_bounds = array<i64: 3, 32, 32>}, {pipeline_mode = #tpu.pipeline_mode<synchronous>, transform_indices = @transform_5, window_bounds = array<i64: 1, 32>}, {pipeline_mode = #tpu.pipeline_mode<synchronous>, transform_indices = @transform_6, window_bounds = array<i64: 8, 32>}, {transform_indices = @transform_7, window_bounds = array<i64: 1, 8, 32>}]} {
    %c0 = arith.constant 0 : index
    %c0_0 = arith.constant 0 : index
    %c0_1 = arith.constant 0 : index
    %0 = vector.load %arg1[%c0, %c0_0, %c0_1] : memref<1x9x8xf32, #tpu.memory_space<vmem>>, vector<1x9x8xf32>
    %1 = vector.shape_cast %0 : vector<1x9x8xf32> to vector<9x8xf32>
    %2 = arith.truncf %1 : vector<9x8xf32> to vector<9x8xbf16>
    %c0_2 = arith.constant 0 : index
    %c0_3 = arith.constant 0 : index
    %c0_4 = arith.constant 0 : index
    %3 = vector.load %arg2[%c0_2, %c0_3, %c0_4] : memref<1x9x8xf32, #tpu.memory_space<vmem>>, vector<1x9x8xf32>
    %4 = vector.shape_cast %3 : vector<1x9x8xf32> to vector<9x8xf32>
    %5 = arith.truncf %4 : vector<9x8xf32> to vector<9x8xbf16>
    %6 = vector.extract_strided_slice %2 {offsets = [0, 0], sizes = [8, 8], strides = [1, 1]} : vector<9x8xbf16> to vector<8x8xbf16>
    %c0_5 = arith.constant 0 : index
    %c0_6 = arith.constant 0 : index
    %c0_7 = arith.constant 0 : index
    %7 = vector.load %arg3[%c0_5, %c0_6, %c0_7] : memref<3x8x32xbf16, #tpu.memory_space<vmem>>, vector<1x8x32xbf16>
    %8 = vector.shape_cast %7 : vector<1x8x32xbf16> to vector<8x32xbf16>
    %cst = arith.constant dense<0.000000e+00> : vector<8x32xf32>
    %9 = tpu.matmul %6, %8, %cst {dimension_numbers = #tpu.dot_dimension_numbers<[1], [0], [0], [1], [0, 0, 1, 1], [], []>} : vector<8x8xbf16>, vector<8x32xbf16>, vector<8x32xf32> -> vector<8x32xf32>
    %10 = vector.extract_strided_slice %5 {offsets = [0, 0], sizes = [8, 8], strides = [1, 1]} : vector<9x8xbf16> to vector<8x8xbf16>
    %c1 = arith.constant 1 : index
    %c0_8 = arith.constant 0 : index
    %c0_9 = arith.constant 0 : index
    %11 = vector.load %arg3[%c1, %c0_8, %c0_9] : memref<3x8x32xbf16, #tpu.memory_space<vmem>>, vector<1x8x32xbf16>
    %12 = vector.shape_cast %11 : vector<1x8x32xbf16> to vector<8x32xbf16>
    %cst_10 = arith.constant dense<0.000000e+00> : vector<8x32xf32>
    %13 = tpu.matmul %10, %12, %cst_10 {dimension_numbers = #tpu.dot_dimension_numbers<[1], [0], [0], [1], [0, 0, 1, 1], [], []>} : vector<8x8xbf16>, vector<8x32xbf16>, vector<8x32xf32> -> vector<8x32xf32>
    %14 = arith.addf %9, %13 : vector<8x32xf32>
    %15 = vector.extract_strided_slice %2 {offsets = [1, 0], sizes = [8, 8], strides = [1, 1]} : vector<9x8xbf16> to vector<8x8xbf16>
    %c2 = arith.constant 2 : index
    %c0_11 = arith.constant 0 : index
    %c0_12 = arith.constant 0 : index
    %16 = vector.load %arg3[%c2, %c0_11, %c0_12] : memref<3x8x32xbf16, #tpu.memory_space<vmem>>, vector<1x8x32xbf16>
    %17 = vector.shape_cast %16 : vector<1x8x32xbf16> to vector<8x32xbf16>
    %cst_13 = arith.constant dense<0.000000e+00> : vector<8x32xf32>
    %18 = tpu.matmul %15, %17, %cst_13 {dimension_numbers = #tpu.dot_dimension_numbers<[1], [0], [0], [1], [0, 0, 1, 1], [], []>} : vector<8x8xbf16>, vector<8x32xbf16>, vector<8x32xf32> -> vector<8x32xf32>
    %19 = arith.addf %14, %18 : vector<8x32xf32>
    %c0_14 = arith.constant 0 : index
    %c0_15 = arith.constant 0 : index
    %20 = vector.load %arg4[%c0_14, %c0_15] : memref<1x32xf32, #tpu.memory_space<vmem>>, vector<1x32xf32>
    %21 = vector.broadcast %20 : vector<1x32xf32> to vector<8x32xf32>
    %22 = arith.addf %19, %21 : vector<8x32xf32>
    %23 = vector.extract_strided_slice %5 {offsets = [0, 0], sizes = [8, 8], strides = [1, 1]} : vector<9x8xbf16> to vector<8x8xbf16>
    %c0_16 = arith.constant 0 : index
    %c0_17 = arith.constant 0 : index
    %c0_18 = arith.constant 0 : index
    %24 = vector.load %arg3[%c0_16, %c0_17, %c0_18] : memref<3x8x32xbf16, #tpu.memory_space<vmem>>, vector<1x8x32xbf16>
    %25 = vector.shape_cast %24 : vector<1x8x32xbf16> to vector<8x32xbf16>
    %cst_19 = arith.constant dense<0.000000e+00> : vector<8x32xf32>
    %26 = tpu.matmul %23, %25, %cst_19 {dimension_numbers = #tpu.dot_dimension_numbers<[1], [0], [0], [1], [0, 0, 1, 1], [], []>} : vector<8x8xbf16>, vector<8x32xbf16>, vector<8x32xf32> -> vector<8x32xf32>
    %27 = vector.extract_strided_slice %2 {offsets = [1, 0], sizes = [8, 8], strides = [1, 1]} : vector<9x8xbf16> to vector<8x8xbf16>
    %c1_20 = arith.constant 1 : index
    %c0_21 = arith.constant 0 : index
    %c0_22 = arith.constant 0 : index
    %28 = vector.load %arg3[%c1_20, %c0_21, %c0_22] : memref<3x8x32xbf16, #tpu.memory_space<vmem>>, vector<1x8x32xbf16>
    %29 = vector.shape_cast %28 : vector<1x8x32xbf16> to vector<8x32xbf16>
    %cst_23 = arith.constant dense<0.000000e+00> : vector<8x32xf32>
    %30 = tpu.matmul %27, %29, %cst_23 {dimension_numbers = #tpu.dot_dimension_numbers<[1], [0], [0], [1], [0, 0, 1, 1], [], []>} : vector<8x8xbf16>, vector<8x32xbf16>, vector<8x32xf32> -> vector<8x32xf32>
    %31 = arith.addf %26, %30 : vector<8x32xf32>
    %32 = vector.extract_strided_slice %5 {offsets = [1, 0], sizes = [8, 8], strides = [1, 1]} : vector<9x8xbf16> to vector<8x8xbf16>
    %c2_24 = arith.constant 2 : index
    %c0_25 = arith.constant 0 : index
    %c0_26 = arith.constant 0 : index
    %33 = vector.load %arg3[%c2_24, %c0_25, %c0_26] : memref<3x8x32xbf16, #tpu.memory_space<vmem>>, vector<1x8x32xbf16>
    %34 = vector.shape_cast %33 : vector<1x8x32xbf16> to vector<8x32xbf16>
    %cst_27 = arith.constant dense<0.000000e+00> : vector<8x32xf32>
    %35 = tpu.matmul %32, %34, %cst_27 {dimension_numbers = #tpu.dot_dimension_numbers<[1], [0], [0], [1], [0, 0, 1, 1], [], []>} : vector<8x8xbf16>, vector<8x32xbf16>, vector<8x32xf32> -> vector<8x32xf32>
    %36 = arith.addf %31, %35 : vector<8x32xf32>
    %c0_28 = arith.constant 0 : index
    %c0_29 = arith.constant 0 : index
    %37 = vector.load %arg4[%c0_28, %c0_29] : memref<1x32xf32, #tpu.memory_space<vmem>>, vector<1x32xf32>
    %38 = vector.broadcast %37 : vector<1x32xf32> to vector<8x32xf32>
    %39 = arith.addf %36, %38 : vector<8x32xf32>
    %cst_30 = arith.constant 5.000000e-01 : f32
    %40 = vector.broadcast %cst_30 : f32 to vector<8x32xf32>
    %41 = arith.mulf %40, %22 : vector<8x32xf32>
    %cst_31 = arith.constant 0.707106769 : f32
    %42 = vector.broadcast %cst_31 : f32 to vector<8x32xf32>
    %43 = arith.mulf %22, %42 : vector<8x32xf32>
    %cst_32 = arith.constant 0.000000e+00 : f32
    %44 = vector.broadcast %cst_32 : f32 to vector<8x32xf32>
    %45 = arith.cmpf oge, %43, %44 : vector<8x32xf32>
    %cst_33 = arith.constant 1.000000e+00 : f32
    %cst_34 = arith.constant -1.000000e+00 : f32
    %46 = vector.broadcast %cst_33 : f32 to vector<8x32xf32>
    %47 = vector.broadcast %cst_34 : f32 to vector<8x32xf32>
    %48 = arith.select %45, %46, %47 : vector<8x32xi1>, vector<8x32xf32>
    %49 = math.absf %43 : vector<8x32xf32>
    %cst_35 = arith.constant 0.327591091 : f32
    %50 = vector.broadcast %cst_35 : f32 to vector<8x32xf32>
    %51 = arith.mulf %50, %49 : vector<8x32xf32>
    %cst_36 = arith.constant 1.000000e+00 : f32
    %52 = vector.broadcast %cst_36 : f32 to vector<8x32xf32>
    %53 = arith.addf %52, %51 : vector<8x32xf32>
    %cst_37 = arith.constant 1.000000e+00 : f32
    %54 = vector.broadcast %cst_37 : f32 to vector<8x32xf32>
    %55 = arith.divf %54, %53 : vector<8x32xf32>
    %cst_38 = arith.constant 1.06140542 : f32
    %56 = vector.broadcast %cst_38 : f32 to vector<8x32xf32>
    %57 = arith.mulf %55, %56 : vector<8x32xf32>
    %cst_39 = arith.constant -1.45315206 : f32
    %58 = vector.broadcast %cst_39 : f32 to vector<8x32xf32>
    %59 = arith.addf %58, %57 : vector<8x32xf32>
    %60 = arith.mulf %55, %59 : vector<8x32xf32>
    %cst_40 = arith.constant 1.42141378 : f32
    %61 = vector.broadcast %cst_40 : f32 to vector<8x32xf32>
    %62 = arith.addf %61, %60 : vector<8x32xf32>
    %63 = arith.mulf %55, %62 : vector<8x32xf32>
    %cst_41 = arith.constant -0.284496725 : f32
    %64 = vector.broadcast %cst_41 : f32 to vector<8x32xf32>
    %65 = arith.addf %64, %63 : vector<8x32xf32>
    %66 = arith.mulf %55, %65 : vector<8x32xf32>
    %cst_42 = arith.constant 0.254829586 : f32
    %67 = vector.broadcast %cst_42 : f32 to vector<8x32xf32>
    %68 = arith.addf %67, %66 : vector<8x32xf32>
    %69 = arith.mulf %55, %68 : vector<8x32xf32>
    %cst_43 = arith.constant 0.000000e+00 : f32
    %70 = vector.broadcast %cst_43 : f32 to vector<8x32xf32>
    %71 = arith.subf %70, %49 : vector<8x32xf32>
    %72 = arith.mulf %71, %49 : vector<8x32xf32>
    %73 = math.exp %72 : vector<8x32xf32>
    %74 = arith.mulf %69, %73 : vector<8x32xf32>
    %cst_44 = arith.constant 1.000000e+00 : f32
    %75 = vector.broadcast %cst_44 : f32 to vector<8x32xf32>
    %76 = arith.subf %75, %74 : vector<8x32xf32>
    %77 = arith.mulf %48, %76 : vector<8x32xf32>
    %cst_45 = arith.constant 1.000000e+00 : f32
    %78 = vector.broadcast %cst_45 : f32 to vector<8x32xf32>
    %79 = arith.addf %78, %77 : vector<8x32xf32>
    %80 = arith.mulf %41, %79 : vector<8x32xf32>
    %81 = arith.truncf %80 : vector<8x32xf32> to vector<8x32xbf16>
    %cst_46 = arith.constant 5.000000e-01 : f32
    %82 = vector.broadcast %cst_46 : f32 to vector<8x32xf32>
    %83 = arith.mulf %82, %39 : vector<8x32xf32>
    %cst_47 = arith.constant 0.707106769 : f32
    %84 = vector.broadcast %cst_47 : f32 to vector<8x32xf32>
    %85 = arith.mulf %39, %84 : vector<8x32xf32>
    %cst_48 = arith.constant 0.000000e+00 : f32
    %86 = vector.broadcast %cst_48 : f32 to vector<8x32xf32>
    %87 = arith.cmpf oge, %85, %86 : vector<8x32xf32>
    %cst_49 = arith.constant 1.000000e+00 : f32
    %cst_50 = arith.constant -1.000000e+00 : f32
    %88 = vector.broadcast %cst_49 : f32 to vector<8x32xf32>
    %89 = vector.broadcast %cst_50 : f32 to vector<8x32xf32>
    %90 = arith.select %87, %88, %89 : vector<8x32xi1>, vector<8x32xf32>
    %91 = math.absf %85 : vector<8x32xf32>
    %cst_51 = arith.constant 0.327591091 : f32
    %92 = vector.broadcast %cst_51 : f32 to vector<8x32xf32>
    %93 = arith.mulf %92, %91 : vector<8x32xf32>
    %cst_52 = arith.constant 1.000000e+00 : f32
    %94 = vector.broadcast %cst_52 : f32 to vector<8x32xf32>
    %95 = arith.addf %94, %93 : vector<8x32xf32>
    %cst_53 = arith.constant 1.000000e+00 : f32
    %96 = vector.broadcast %cst_53 : f32 to vector<8x32xf32>
    %97 = arith.divf %96, %95 : vector<8x32xf32>
    %cst_54 = arith.constant 1.06140542 : f32
    %98 = vector.broadcast %cst_54 : f32 to vector<8x32xf32>
    %99 = arith.mulf %97, %98 : vector<8x32xf32>
    %cst_55 = arith.constant -1.45315206 : f32
    %100 = vector.broadcast %cst_55 : f32 to vector<8x32xf32>
    %101 = arith.addf %100, %99 : vector<8x32xf32>
    %102 = arith.mulf %97, %101 : vector<8x32xf32>
    %cst_56 = arith.constant 1.42141378 : f32
    %103 = vector.broadcast %cst_56 : f32 to vector<8x32xf32>
    %104 = arith.addf %103, %102 : vector<8x32xf32>
    %105 = arith.mulf %97, %104 : vector<8x32xf32>
    %cst_57 = arith.constant -0.284496725 : f32
    %106 = vector.broadcast %cst_57 : f32 to vector<8x32xf32>
    %107 = arith.addf %106, %105 : vector<8x32xf32>
    %108 = arith.mulf %97, %107 : vector<8x32xf32>
    %cst_58 = arith.constant 0.254829586 : f32
    %109 = vector.broadcast %cst_58 : f32 to vector<8x32xf32>
    %110 = arith.addf %109, %108 : vector<8x32xf32>
    %111 = arith.mulf %97, %110 : vector<8x32xf32>
    %cst_59 = arith.constant 0.000000e+00 : f32
    %112 = vector.broadcast %cst_59 : f32 to vector<8x32xf32>
    %113 = arith.subf %112, %91 : vector<8x32xf32>
    %114 = arith.mulf %113, %91 : vector<8x32xf32>
    %115 = math.exp %114 : vector<8x32xf32>
    %116 = arith.mulf %111, %115 : vector<8x32xf32>
    %cst_60 = arith.constant 1.000000e+00 : f32
    %117 = vector.broadcast %cst_60 : f32 to vector<8x32xf32>
    %118 = arith.subf %117, %116 : vector<8x32xf32>
    %119 = arith.mulf %90, %118 : vector<8x32xf32>
    %cst_61 = arith.constant 1.000000e+00 : f32
    %120 = vector.broadcast %cst_61 : f32 to vector<8x32xf32>
    %121 = arith.addf %120, %119 : vector<8x32xf32>
    %122 = arith.mulf %83, %121 : vector<8x32xf32>
    %123 = arith.truncf %122 : vector<8x32xf32> to vector<8x32xbf16>
    %c1_62 = arith.constant 1 : index
    %c0_63 = arith.constant 0 : index
    %c0_64 = arith.constant 0 : index
    %124 = vector.load %arg5[%c1_62, %c0_63, %c0_64] : memref<3x32x32xbf16, #tpu.memory_space<vmem>>, vector<1x32x32xbf16>
    %125 = vector.shape_cast %124 : vector<1x32x32xbf16> to vector<32x32xbf16>
    %cst_65 = arith.constant dense<0.000000e+00> : vector<8x32xf32>
    %126 = tpu.matmul %81, %125, %cst_65 {dimension_numbers = #tpu.dot_dimension_numbers<[1], [0], [0], [1], [0, 0, 1, 1], [], []>} : vector<8x32xbf16>, vector<32x32xbf16>, vector<8x32xf32> -> vector<8x32xf32>
    %c2_66 = arith.constant 2 : index
    %c0_67 = arith.constant 0 : index
    %c0_68 = arith.constant 0 : index
    %127 = vector.load %arg5[%c2_66, %c0_67, %c0_68] : memref<3x32x32xbf16, #tpu.memory_space<vmem>>, vector<1x32x32xbf16>
    %128 = vector.shape_cast %127 : vector<1x32x32xbf16> to vector<32x32xbf16>
    %cst_69 = arith.constant dense<0.000000e+00> : vector<8x32xf32>
    %129 = tpu.matmul %123, %128, %cst_69 {dimension_numbers = #tpu.dot_dimension_numbers<[1], [0], [0], [1], [0, 0, 1, 1], [], []>} : vector<8x32xbf16>, vector<32x32xbf16>, vector<8x32xf32> -> vector<8x32xf32>
    %130 = arith.addf %126, %129 : vector<8x32xf32>
    %c0_70 = arith.constant 0 : index
    %c0_71 = arith.constant 0 : index
    %131 = vector.load %arg6[%c0_70, %c0_71] : memref<1x32xf32, #tpu.memory_space<vmem>>, vector<1x32xf32>
    %132 = vector.broadcast %131 : vector<1x32xf32> to vector<8x32xf32>
    %133 = arith.addf %130, %132 : vector<8x32xf32>
    %c0_72 = arith.constant 0 : index
    %c0_73 = arith.constant 0 : index
    %c0_74 = arith.constant 0 : index
    %134 = vector.load %arg5[%c0_72, %c0_73, %c0_74] : memref<3x32x32xbf16, #tpu.memory_space<vmem>>, vector<1x32x32xbf16>
    %135 = vector.shape_cast %134 : vector<1x32x32xbf16> to vector<32x32xbf16>
    %cst_75 = arith.constant dense<0.000000e+00> : vector<8x32xf32>
    %136 = tpu.matmul %123, %135, %cst_75 {dimension_numbers = #tpu.dot_dimension_numbers<[1], [0], [0], [1], [0, 0, 1, 1], [], []>} : vector<8x32xbf16>, vector<32x32xbf16>, vector<8x32xf32> -> vector<8x32xf32>
    %137 = vector.extract_strided_slice %133 {offsets = [0, 0], sizes = [1, 32], strides = [1, 1]} : vector<8x32xf32> to vector<1x32xf32>
    %cst_76 = arith.constant 5.000000e-01 : f32
    %138 = vector.broadcast %cst_76 : f32 to vector<1x32xf32>
    %139 = arith.mulf %138, %137 : vector<1x32xf32>
    %cst_77 = arith.constant 0.707106769 : f32
    %140 = vector.broadcast %cst_77 : f32 to vector<1x32xf32>
    %141 = arith.mulf %137, %140 : vector<1x32xf32>
    %cst_78 = arith.constant 0.000000e+00 : f32
    %142 = vector.broadcast %cst_78 : f32 to vector<1x32xf32>
    %143 = arith.cmpf oge, %141, %142 : vector<1x32xf32>
    %cst_79 = arith.constant 1.000000e+00 : f32
    %cst_80 = arith.constant -1.000000e+00 : f32
    %144 = vector.broadcast %cst_79 : f32 to vector<1x32xf32>
    %145 = vector.broadcast %cst_80 : f32 to vector<1x32xf32>
    %146 = arith.select %143, %144, %145 : vector<1x32xi1>, vector<1x32xf32>
    %147 = math.absf %141 : vector<1x32xf32>
    %cst_81 = arith.constant 0.327591091 : f32
    %148 = vector.broadcast %cst_81 : f32 to vector<1x32xf32>
    %149 = arith.mulf %148, %147 : vector<1x32xf32>
    %cst_82 = arith.constant 1.000000e+00 : f32
    %150 = vector.broadcast %cst_82 : f32 to vector<1x32xf32>
    %151 = arith.addf %150, %149 : vector<1x32xf32>
    %cst_83 = arith.constant 1.000000e+00 : f32
    %152 = vector.broadcast %cst_83 : f32 to vector<1x32xf32>
    %153 = arith.divf %152, %151 : vector<1x32xf32>
    %cst_84 = arith.constant 1.06140542 : f32
    %154 = vector.broadcast %cst_84 : f32 to vector<1x32xf32>
    %155 = arith.mulf %153, %154 : vector<1x32xf32>
    %cst_85 = arith.constant -1.45315206 : f32
    %156 = vector.broadcast %cst_85 : f32 to vector<1x32xf32>
    %157 = arith.addf %156, %155 : vector<1x32xf32>
    %158 = arith.mulf %153, %157 : vector<1x32xf32>
    %cst_86 = arith.constant 1.42141378 : f32
    %159 = vector.broadcast %cst_86 : f32 to vector<1x32xf32>
    %160 = arith.addf %159, %158 : vector<1x32xf32>
    %161 = arith.mulf %153, %160 : vector<1x32xf32>
    %cst_87 = arith.constant -0.284496725 : f32
    %162 = vector.broadcast %cst_87 : f32 to vector<1x32xf32>
    %163 = arith.addf %162, %161 : vector<1x32xf32>
    %164 = arith.mulf %153, %163 : vector<1x32xf32>
    %cst_88 = arith.constant 0.254829586 : f32
    %165 = vector.broadcast %cst_88 : f32 to vector<1x32xf32>
    %166 = arith.addf %165, %164 : vector<1x32xf32>
    %167 = arith.mulf %153, %166 : vector<1x32xf32>
    %cst_89 = arith.constant 0.000000e+00 : f32
    %168 = vector.broadcast %cst_89 : f32 to vector<1x32xf32>
    %169 = arith.subf %168, %147 : vector<1x32xf32>
    %170 = arith.mulf %169, %147 : vector<1x32xf32>
    %171 = math.exp %170 : vector<1x32xf32>
    %172 = arith.mulf %167, %171 : vector<1x32xf32>
    %cst_90 = arith.constant 1.000000e+00 : f32
    %173 = vector.broadcast %cst_90 : f32 to vector<1x32xf32>
    %174 = arith.subf %173, %172 : vector<1x32xf32>
    %175 = arith.mulf %146, %174 : vector<1x32xf32>
    %cst_91 = arith.constant 1.000000e+00 : f32
    %176 = vector.broadcast %cst_91 : f32 to vector<1x32xf32>
    %177 = arith.addf %176, %175 : vector<1x32xf32>
    %178 = arith.mulf %139, %177 : vector<1x32xf32>
    %c0_92 = arith.constant 0 : index
    %c0_93 = arith.constant 0 : index
    %179 = vector.load %arg7[%c0_92, %c0_93] : memref<8x32xf32, #tpu.memory_space<vmem>>, vector<1x32xf32>
    %180 = arith.addf %178, %179 : vector<1x32xf32>
    %c0_94 = arith.constant 0 : index
    %c0_95 = arith.constant 0 : index
    %c0_96 = arith.constant 0 : index
    %181 = vector.load %arg8[%c0_94, %c0_95, %c0_96] : memref<1x8x32xf32, #tpu.memory_space<vmem>>, vector<1x1x32xf32>
    %182 = vector.shape_cast %181 : vector<1x1x32xf32> to vector<1x32xf32>
    %183 = vector.shape_cast %180 : vector<1x32xf32> to vector<1x1x32xf32>
    tpu.vector_store %arg8[%c0_94, %c0_95, %c0_96], %183 {strides = array<i32>} : memref<1x8x32xf32, #tpu.memory_space<vmem>>, vector<1x1x32xf32>,
    %184 = vector.extract_strided_slice %133 {offsets = [1, 0], sizes = [7, 32], strides = [1, 1]} : vector<8x32xf32> to vector<7x32xf32>
    %185 = vector.extract_strided_slice %136 {offsets = [0, 0], sizes = [7, 32], strides = [1, 1]} : vector<8x32xf32> to vector<7x32xf32>
    %186 = arith.addf %184, %185 : vector<7x32xf32>
    %cst_97 = arith.constant 5.000000e-01 : f32
    %187 = vector.broadcast %cst_97 : f32 to vector<7x32xf32>
    %188 = arith.mulf %187, %186 : vector<7x32xf32>
    %cst_98 = arith.constant 0.707106769 : f32
    %189 = vector.broadcast %cst_98 : f32 to vector<7x32xf32>
    %190 = arith.mulf %186, %189 : vector<7x32xf32>
    %cst_99 = arith.constant 0.000000e+00 : f32
    %191 = vector.broadcast %cst_99 : f32 to vector<7x32xf32>
    %192 = arith.cmpf oge, %190, %191 : vector<7x32xf32>
    %cst_100 = arith.constant 1.000000e+00 : f32
    %cst_101 = arith.constant -1.000000e+00 : f32
    %193 = vector.broadcast %cst_100 : f32 to vector<7x32xf32>
    %194 = vector.broadcast %cst_101 : f32 to vector<7x32xf32>
    %195 = arith.select %192, %193, %194 : vector<7x32xi1>, vector<7x32xf32>
    %196 = math.absf %190 : vector<7x32xf32>
    %cst_102 = arith.constant 0.327591091 : f32
    %197 = vector.broadcast %cst_102 : f32 to vector<7x32xf32>
    %198 = arith.mulf %197, %196 : vector<7x32xf32>
    %cst_103 = arith.constant 1.000000e+00 : f32
    %199 = vector.broadcast %cst_103 : f32 to vector<7x32xf32>
    %200 = arith.addf %199, %198 : vector<7x32xf32>
    %cst_104 = arith.constant 1.000000e+00 : f32
    %201 = vector.broadcast %cst_104 : f32 to vector<7x32xf32>
    %202 = arith.divf %201, %200 : vector<7x32xf32>
    %cst_105 = arith.constant 1.06140542 : f32
    %203 = vector.broadcast %cst_105 : f32 to vector<7x32xf32>
    %204 = arith.mulf %202, %203 : vector<7x32xf32>
    %cst_106 = arith.constant -1.45315206 : f32
    %205 = vector.broadcast %cst_106 : f32 to vector<7x32xf32>
    %206 = arith.addf %205, %204 : vector<7x32xf32>
    %207 = arith.mulf %202, %206 : vector<7x32xf32>
    %cst_107 = arith.constant 1.42141378 : f32
    %208 = vector.broadcast %cst_107 : f32 to vector<7x32xf32>
    %209 = arith.addf %208, %207 : vector<7x32xf32>
    %210 = arith.mulf %202, %209 : vector<7x32xf32>
    %cst_108 = arith.constant -0.284496725 : f32
    %211 = vector.broadcast %cst_108 : f32 to vector<7x32xf32>
    %212 = arith.addf %211, %210 : vector<7x32xf32>
    %213 = arith.mulf %202, %212 : vector<7x32xf32>
    %cst_109 = arith.constant 0.254829586 : f32
    %214 = vector.broadcast %cst_109 : f32 to vector<7x32xf32>
    %215 = arith.addf %214, %213 : vector<7x32xf32>
    %216 = arith.mulf %202, %215 : vector<7x32xf32>
    %cst_110 = arith.constant 0.000000e+00 : f32
    %217 = vector.broadcast %cst_110 : f32 to vector<7x32xf32>
    %218 = arith.subf %217, %196 : vector<7x32xf32>
    %219 = arith.mulf %218, %196 : vector<7x32xf32>
    %220 = math.exp %219 : vector<7x32xf32>
    %221 = arith.mulf %216, %220 : vector<7x32xf32>
    %cst_111 = arith.constant 1.000000e+00 : f32
    %222 = vector.broadcast %cst_111 : f32 to vector<7x32xf32>
    %223 = arith.subf %222, %221 : vector<7x32xf32>
    %224 = arith.mulf %195, %223 : vector<7x32xf32>
    %cst_112 = arith.constant 1.000000e+00 : f32
    %225 = vector.broadcast %cst_112 : f32 to vector<7x32xf32>
    %226 = arith.addf %225, %224 : vector<7x32xf32>
    %227 = arith.mulf %188, %226 : vector<7x32xf32>
    %c1_113 = arith.constant 1 : index
    %c0_114 = arith.constant 0 : index
    %228 = vector.load %arg7[%c1_113, %c0_114] : memref<8x32xf32, #tpu.memory_space<vmem>>, vector<7x32xf32>
    %229 = arith.addf %227, %228 : vector<7x32xf32>
    %c0_115 = arith.constant 0 : index
    %c1_116 = arith.constant 1 : index
    %c0_117 = arith.constant 0 : index
    %230 = vector.load %arg8[%c0_115, %c1_116, %c0_117] : memref<1x8x32xf32, #tpu.memory_space<vmem>>, vector<1x7x32xf32>
    %231 = vector.shape_cast %230 : vector<1x7x32xf32> to vector<7x32xf32>
    %232 = vector.shape_cast %229 : vector<7x32xf32> to vector<1x7x32xf32>
    tpu.vector_store %arg8[%c0_115, %c1_116, %c0_117], %232 {strides = array<i32>} : memref<1x8x32xf32, #tpu.memory_space<vmem>>, vector<1x7x32xf32>,
    return
  }
  func.func @transform_0(%arg0: i32) -> (i32, i32, i32) {
    %c0_i32 = arith.constant 0 : i32
    %c0_i32_0 = arith.constant 0 : i32
    %c0_i32_1 = arith.constant 0 : i32
    return %arg0, %c0_i32, %c0_i32_0 : i32, i32, i32
  }
  func.func @transform_1(%arg0: i32) -> (i32, i32, i32) {
    %c0_i32 = arith.constant 0 : i32
    %c0_i32_0 = arith.constant 0 : i32
    %c0_i32_1 = arith.constant 0 : i32
    return %arg0, %c0_i32, %c0_i32_0 : i32, i32, i32
  }
  func.func @transform_2(%arg0: i32) -> (i32, i32, i32) {
    %c0_i32 = arith.constant 0 : i32
    %c0_i32_0 = arith.constant 0 : i32
    %c0_i32_1 = arith.constant 0 : i32
    %c0_i32_2 = arith.constant 0 : i32
    return %c0_i32, %c0_i32_0, %c0_i32_1 : i32, i32, i32
  }
  func.func @transform_3(%arg0: i32) -> (i32, i32) {
    %c0_i32 = arith.constant 0 : i32
    %c0_i32_0 = arith.constant 0 : i32
    %c0_i32_1 = arith.constant 0 : i32
    return %c0_i32, %c0_i32_0 : i32, i32
  }
  func.func @transform_4(%arg0: i32) -> (i32, i32, i32) {
    %c0_i32 = arith.constant 0 : i32
    %c0_i32_0 = arith.constant 0 : i32
    %c0_i32_1 = arith.constant 0 : i32
    %c0_i32_2 = arith.constant 0 : i32
    return %c0_i32, %c0_i32_0, %c0_i32_1 : i32, i32, i32
  }
  func.func @transform_5(%arg0: i32) -> (i32, i32) {
    %c0_i32 = arith.constant 0 : i32
    %c0_i32_0 = arith.constant 0 : i32
    %c0_i32_1 = arith.constant 0 : i32
    return %c0_i32, %c0_i32_0 : i32, i32
  }
  func.func @transform_6(%arg0: i32) -> (i32, i32) {
    %c0_i32 = arith.constant 0 : i32
    %c0_i32_0 = arith.constant 0 : i32
    %c0_i32_1 = arith.constant 0 : i32
    return %c0_i32, %c0_i32_0 : i32, i32
  }
  func.func @transform_7(%arg0: i32) -> (i32, i32, i32) {
    %c0_i32 = arith.constant 0 : i32
    %c0_i32_0 = arith.constant 0 : i32
    %c0_i32_1 = arith.constant 0 : i32
    return %arg0, %c0_i32, %c0_i32_0 : i32, i32, i32
  }
}

module attributes {stable_mosaic.version = 11 : i64} {
  func.func @_layers_kernel(%arg0: i32, %arg1: memref<16x32xf32, #tpu.memory_space<vmem>>, %arg2: memref<1x1x32xf32, #tpu.memory_space<vmem>>, %arg3: memref<1x1x32xf32, #tpu.memory_space<vmem>>, %arg4: memref<1x32x96xbf16, #tpu.memory_space<vmem>>, %arg5: memref<1x1x96xf32, #tpu.memory_space<vmem>>, %arg6: memref<1x32x32xbf16, #tpu.memory_space<vmem>>, %arg7: memref<1x1x32xf32, #tpu.memory_space<vmem>>, %arg8: memref<1x1x32xf32, #tpu.memory_space<vmem>>, %arg9: memref<1x1x32xf32, #tpu.memory_space<vmem>>, %arg10: memref<1x32x128xbf16, #tpu.memory_space<vmem>>, %arg11: memref<1x1x128xf32, #tpu.memory_space<vmem>>, %arg12: memref<1x128x32xbf16, #tpu.memory_space<vmem>>, %arg13: memref<1x1x32xf32, #tpu.memory_space<vmem>>, %arg14: memref<1x32xf32, #tpu.memory_space<vmem>>, %arg15: memref<1x32xf32, #tpu.memory_space<vmem>>, %arg16: memref<16x32xf32, #tpu.memory_space<vmem>>, %arg17: memref<16x32xf32, #tpu.memory_space<vmem>>, %arg18: memref<16x32xbf16, #tpu.memory_space<vmem>>) attributes {dimension_semantics = [#tpu.dimension_semantics<arbitrary>], iteration_bounds = array<i64: 2>, scalar_prefetch = 0 : i64, scratch_operands = 2 : i64, tpu.core_type = #tpu.core_type<tc>, window_params = [{pipeline_mode = #tpu.pipeline_mode<synchronous>, transform_indices = @transform_0, window_bounds = array<i64: 16, 32>}, {transform_indices = @transform_1, window_bounds = array<i64: 1, 1, 32>}, {transform_indices = @transform_2, window_bounds = array<i64: 1, 1, 32>}, {transform_indices = @transform_3, window_bounds = array<i64: 1, 32, 96>}, {transform_indices = @transform_4, window_bounds = array<i64: 1, 1, 96>}, {transform_indices = @transform_5, window_bounds = array<i64: 1, 32, 32>}, {transform_indices = @transform_6, window_bounds = array<i64: 1, 1, 32>}, {transform_indices = @transform_7, window_bounds = array<i64: 1, 1, 32>}, {transform_indices = @transform_8, window_bounds = array<i64: 1, 1, 32>}, {transform_indices = @transform_9, window_bounds = array<i64: 1, 32, 128>}, {transform_indices = @transform_10, window_bounds = array<i64: 1, 1, 128>}, {transform_indices = @transform_11, window_bounds = array<i64: 1, 128, 32>}, {transform_indices = @transform_12, window_bounds = array<i64: 1, 1, 32>}, {pipeline_mode = #tpu.pipeline_mode<synchronous>, transform_indices = @transform_13, window_bounds = array<i64: 1, 32>}, {pipeline_mode = #tpu.pipeline_mode<synchronous>, transform_indices = @transform_14, window_bounds = array<i64: 1, 32>}, {pipeline_mode = #tpu.pipeline_mode<synchronous>, transform_indices = @transform_15, window_bounds = array<i64: 16, 32>}]} {
    %c0_i32 = arith.constant 0 : i32
    %0 = arith.cmpi eq, %arg0, %c0_i32 : i32
    %1 = arith.extui %0 : i1 to i32
    %c0_i32_0 = arith.constant 0 : i32
    %2 = arith.cmpi ne, %1, %c0_i32_0 : i32
    scf.if %2 {
      %c0_93 = arith.constant 0 : index
      %c0_94 = arith.constant 0 : index
      %220 = vector.load %arg1[%c0_93, %c0_94] : memref<16x32xf32, #tpu.memory_space<vmem>>, vector<16x32xf32>
      %c0_95 = arith.constant 0 : index
      %c0_96 = arith.constant 0 : index
      %221 = vector.load %arg17[%c0_95, %c0_96] : memref<16x32xf32, #tpu.memory_space<vmem>>, vector<16x32xf32>
      tpu.vector_store %arg17[%c0_95, %c0_96], %220 {strides = array<i32>} : memref<16x32xf32, #tpu.memory_space<vmem>>, vector<16x32xf32>,
    } else {
    }
    %c0 = arith.constant 0 : index
    %c0_1 = arith.constant 0 : index
    %3 = vector.load %arg17[%c0, %c0_1] : memref<16x32xf32, #tpu.memory_space<vmem>>, vector<16x32xf32>
    %c0_2 = arith.constant 0 : index
    %c0_3 = arith.constant 0 : index
    %c0_4 = arith.constant 0 : index
    %4 = vector.load %arg2[%c0_2, %c0_3, %c0_4] : memref<1x1x32xf32, #tpu.memory_space<vmem>>, vector<1x1x32xf32>
    %5 = vector.shape_cast %4 : vector<1x1x32xf32> to vector<1x32xf32>
    %c0_5 = arith.constant 0 : index
    %c0_6 = arith.constant 0 : index
    %c0_7 = arith.constant 0 : index
    %6 = vector.load %arg3[%c0_5, %c0_6, %c0_7] : memref<1x1x32xf32, #tpu.memory_space<vmem>>, vector<1x1x32xf32>
    %7 = vector.shape_cast %6 : vector<1x1x32xf32> to vector<1x32xf32>
    %cst = arith.constant dense<0.000000e+00> : vector<16xf32>
    %8 = vector.multi_reduction <add>, %3, %cst [1] : vector<16x32xf32> to vector<16xf32>
    %9 = vector.shape_cast %8 : vector<16xf32> to vector<16x1xf32>
    %cst_8 = arith.constant 3.200000e+01 : f32
    %10 = vector.broadcast %cst_8 : f32 to vector<16x1xf32>
    %11 = arith.divf %9, %10 : vector<16x1xf32>
    %12 = vector.broadcast %11 : vector<16x1xf32> to vector<16x32xf32>
    %13 = arith.subf %3, %12 : vector<16x32xf32>
    %14 = arith.mulf %13, %13 : vector<16x32xf32>
    %cst_9 = arith.constant dense<0.000000e+00> : vector<16xf32>
    %15 = vector.multi_reduction <add>, %14, %cst_9 [1] : vector<16x32xf32> to vector<16xf32>
    %16 = vector.shape_cast %15 : vector<16xf32> to vector<16x1xf32>
    %cst_10 = arith.constant 3.200000e+01 : f32
    %17 = vector.broadcast %cst_10 : f32 to vector<16x1xf32>
    %18 = arith.divf %16, %17 : vector<16x1xf32>
    %19 = vector.broadcast %11 : vector<16x1xf32> to vector<16x32xf32>
    %20 = arith.subf %3, %19 : vector<16x32xf32>
    %cst_11 = arith.constant 9.99999974E-6 : f32
    %21 = vector.broadcast %cst_11 : f32 to vector<16x1xf32>
    %22 = arith.addf %18, %21 : vector<16x1xf32>
    %23 = math.rsqrt %22 : vector<16x1xf32>
    %24 = vector.broadcast %23 : vector<16x1xf32> to vector<16x32xf32>
    %25 = arith.mulf %20, %24 : vector<16x32xf32>
    %26 = vector.broadcast %5 : vector<1x32xf32> to vector<16x32xf32>
    %27 = arith.mulf %25, %26 : vector<16x32xf32>
    %28 = vector.broadcast %7 : vector<1x32xf32> to vector<16x32xf32>
    %29 = arith.addf %27, %28 : vector<16x32xf32>
    %30 = arith.truncf %29 : vector<16x32xf32> to vector<16x32xbf16>
    %c0_12 = arith.constant 0 : index
    %c0_13 = arith.constant 0 : index
    %c0_14 = arith.constant 0 : index
    %31 = vector.load %arg4[%c0_12, %c0_13, %c0_14] : memref<1x32x96xbf16, #tpu.memory_space<vmem>>, vector<1x32x96xbf16>
    %32 = vector.shape_cast %31 : vector<1x32x96xbf16> to vector<32x96xbf16>
    %cst_15 = arith.constant dense<0.000000e+00> : vector<16x96xf32>
    %33 = tpu.matmul %30, %32, %cst_15 {dimension_numbers = #tpu.dot_dimension_numbers<[1], [0], [0], [1], [0, 0, 1, 1], [], []>} : vector<16x32xbf16>, vector<32x96xbf16>, vector<16x96xf32> -> vector<16x96xf32>
    %c0_16 = arith.constant 0 : index
    %c0_17 = arith.constant 0 : index
    %c0_18 = arith.constant 0 : index
    %34 = vector.load %arg5[%c0_16, %c0_17, %c0_18] : memref<1x1x96xf32, #tpu.memory_space<vmem>>, vector<1x1x96xf32>
    %35 = vector.shape_cast %34 : vector<1x1x96xf32> to vector<1x96xf32>
    %36 = vector.broadcast %35 : vector<1x96xf32> to vector<16x96xf32>
    %37 = arith.addf %33, %36 : vector<16x96xf32>
    %38 = vector.extract_strided_slice %37 {offsets = [0, 0], sizes = [16, 32], strides = [1, 1]} : vector<16x96xf32> to vector<16x32xf32>
    %39 = arith.truncf %38 : vector<16x32xf32> to vector<16x32xbf16>
    %40 = vector.shape_cast %39 : vector<16x32xbf16> to vector<2x8x32xbf16>
    %41 = vector.extract_strided_slice %37 {offsets = [0, 32], sizes = [16, 32], strides = [1, 1]} : vector<16x96xf32> to vector<16x32xf32>
    %42 = arith.truncf %41 : vector<16x32xf32> to vector<16x32xbf16>
    %43 = vector.shape_cast %42 : vector<16x32xbf16> to vector<2x8x32xbf16>
    %44 = vector.extract_strided_slice %37 {offsets = [0, 64], sizes = [16, 32], strides = [1, 1]} : vector<16x96xf32> to vector<16x32xf32>
    %45 = arith.truncf %44 : vector<16x32xf32> to vector<16x32xbf16>
    %46 = vector.shape_cast %45 : vector<16x32xbf16> to vector<2x8x32xbf16>
    %47 = vector.extract_strided_slice %40 {offsets = [0, 0, 0], sizes = [2, 8, 8], strides = [1, 1, 1]} : vector<2x8x32xbf16> to vector<2x8x8xbf16>
    %48 = vector.extract_strided_slice %43 {offsets = [0, 0, 0], sizes = [2, 8, 8], strides = [1, 1, 1]} : vector<2x8x32xbf16> to vector<2x8x8xbf16>
    "tpu.trace_start"() <{level = 10 : i32, message = "bqd,bkd->bqk"}> : () -> ()
    %cst_19 = arith.constant dense<0.000000e+00> : vector<2x8x8xf32>
    %49 = tpu.matmul %47, %48, %cst_19 {dimension_numbers = #tpu.dot_dimension_numbers<[2], [2], [1], [1], [0, 0, 0, 1, 1, 1], [0], [0]>} : vector<2x8x8xbf16>, vector<2x8x8xbf16>, vector<2x8x8xf32> -> vector<2x8x8xf32>
    "tpu.trace_stop"() : () -> ()
    %cst_20 = arith.constant dense<0xFF800000> : vector<2x8xf32>
    %50 = vector.multi_reduction <maximumf>, %49, %cst_20 [2] : vector<2x8x8xf32> to vector<2x8xf32>
    %51 = vector.shape_cast %50 : vector<2x8xf32> to vector<2x8x1xf32>
    %52 = vector.broadcast %51 : vector<2x8x1xf32> to vector<2x8x8xf32>
    %53 = arith.subf %49, %52 : vector<2x8x8xf32>
    %54 = math.exp %53 : vector<2x8x8xf32>
    %cst_21 = arith.constant dense<0.000000e+00> : vector<2x8xf32>
    %55 = vector.multi_reduction <add>, %54, %cst_21 [2] : vector<2x8x8xf32> to vector<2x8xf32>
    %56 = vector.shape_cast %55 : vector<2x8xf32> to vector<2x8x1xf32>
    %57 = tpu.reciprocal %56 {approx = true} : vector<2x8x1xf32> -> vector<2x8x1xf32>
    %58 = vector.broadcast %57 : vector<2x8x1xf32> to vector<2x8x8xf32>
    %59 = arith.mulf %54, %58 : vector<2x8x8xf32>
    %60 = arith.truncf %59 : vector<2x8x8xf32> to vector<2x8x8xbf16>
    %61 = vector.extract_strided_slice %46 {offsets = [0, 0, 0], sizes = [2, 8, 8], strides = [1, 1, 1]} : vector<2x8x32xbf16> to vector<2x8x8xbf16>
    "tpu.trace_start"() <{level = 10 : i32, message = "bqk,bkd->bqd"}> : () -> ()
    %cst_22 = arith.constant dense<0.000000e+00> : vector<2x8x8xf32>
    %62 = tpu.matmul %60, %61, %cst_22 {dimension_numbers = #tpu.dot_dimension_numbers<[2], [1], [1], [2], [0, 0, 0, 1, 1, 2], [0], [0]>} : vector<2x8x8xbf16>, vector<2x8x8xbf16>, vector<2x8x8xf32> -> vector<2x8x8xf32>
    "tpu.trace_stop"() : () -> ()
    %63 = vector.shape_cast %62 : vector<2x8x8xf32> to vector<16x8xf32>
    %64 = arith.truncf %63 : vector<16x8xf32> to vector<16x8xbf16>
    %c0_23 = arith.constant 0 : index
    %c0_24 = arith.constant 0 : index
    %65 = vector.load %arg18[%c0_23, %c0_24] : memref<16x32xbf16, #tpu.memory_space<vmem>>, vector<16x8xbf16>
    tpu.vector_store %arg18[%c0_23, %c0_24], %64 {strides = array<i32>} : memref<16x32xbf16, #tpu.memory_space<vmem>>, vector<16x8xbf16>,
    %66 = vector.extract_strided_slice %40 {offsets = [0, 0, 8], sizes = [2, 8, 8], strides = [1, 1, 1]} : vector<2x8x32xbf16> to vector<2x8x8xbf16>
    %67 = vector.extract_strided_slice %43 {offsets = [0, 0, 8], sizes = [2, 8, 8], strides = [1, 1, 1]} : vector<2x8x32xbf16> to vector<2x8x8xbf16>
    "tpu.trace_start"() <{level = 10 : i32, message = "bqd,bkd->bqk"}> : () -> ()
    %cst_25 = arith.constant dense<0.000000e+00> : vector<2x8x8xf32>
    %68 = tpu.matmul %66, %67, %cst_25 {dimension_numbers = #tpu.dot_dimension_numbers<[2], [2], [1], [1], [0, 0, 0, 1, 1, 1], [0], [0]>} : vector<2x8x8xbf16>, vector<2x8x8xbf16>, vector<2x8x8xf32> -> vector<2x8x8xf32>
    "tpu.trace_stop"() : () -> ()
    %cst_26 = arith.constant dense<0xFF800000> : vector<2x8xf32>
    %69 = vector.multi_reduction <maximumf>, %68, %cst_26 [2] : vector<2x8x8xf32> to vector<2x8xf32>
    %70 = vector.shape_cast %69 : vector<2x8xf32> to vector<2x8x1xf32>
    %71 = vector.broadcast %70 : vector<2x8x1xf32> to vector<2x8x8xf32>
    %72 = arith.subf %68, %71 : vector<2x8x8xf32>
    %73 = math.exp %72 : vector<2x8x8xf32>
    %cst_27 = arith.constant dense<0.000000e+00> : vector<2x8xf32>
    %74 = vector.multi_reduction <add>, %73, %cst_27 [2] : vector<2x8x8xf32> to vector<2x8xf32>
    %75 = vector.shape_cast %74 : vector<2x8xf32> to vector<2x8x1xf32>
    %76 = tpu.reciprocal %75 {approx = true} : vector<2x8x1xf32> -> vector<2x8x1xf32>
    %77 = vector.broadcast %76 : vector<2x8x1xf32> to vector<2x8x8xf32>
    %78 = arith.mulf %73, %77 : vector<2x8x8xf32>
    %79 = arith.truncf %78 : vector<2x8x8xf32> to vector<2x8x8xbf16>
    %80 = vector.extract_strided_slice %46 {offsets = [0, 0, 8], sizes = [2, 8, 8], strides = [1, 1, 1]} : vector<2x8x32xbf16> to vector<2x8x8xbf16>
    "tpu.trace_start"() <{level = 10 : i32, message = "bqk,bkd->bqd"}> : () -> ()
    %cst_28 = arith.constant dense<0.000000e+00> : vector<2x8x8xf32>
    %81 = tpu.matmul %79, %80, %cst_28 {dimension_numbers = #tpu.dot_dimension_numbers<[2], [1], [1], [2], [0, 0, 0, 1, 1, 2], [0], [0]>} : vector<2x8x8xbf16>, vector<2x8x8xbf16>, vector<2x8x8xf32> -> vector<2x8x8xf32>
    "tpu.trace_stop"() : () -> ()
    %82 = vector.shape_cast %81 : vector<2x8x8xf32> to vector<16x8xf32>
    %83 = arith.truncf %82 : vector<16x8xf32> to vector<16x8xbf16>
    %c0_29 = arith.constant 0 : index
    %c8 = arith.constant 8 : index
    %84 = vector.load %arg18[%c0_29, %c8] : memref<16x32xbf16, #tpu.memory_space<vmem>>, vector<16x8xbf16>
    tpu.vector_store %arg18[%c0_29, %c8], %83 {strides = array<i32>} : memref<16x32xbf16, #tpu.memory_space<vmem>>, vector<16x8xbf16>,
    %85 = vector.extract_strided_slice %40 {offsets = [0, 0, 16], sizes = [2, 8, 8], strides = [1, 1, 1]} : vector<2x8x32xbf16> to vector<2x8x8xbf16>
    %86 = vector.extract_strided_slice %43 {offsets = [0, 0, 16], sizes = [2, 8, 8], strides = [1, 1, 1]} : vector<2x8x32xbf16> to vector<2x8x8xbf16>
    "tpu.trace_start"() <{level = 10 : i32, message = "bqd,bkd->bqk"}> : () -> ()
    %cst_30 = arith.constant dense<0.000000e+00> : vector<2x8x8xf32>
    %87 = tpu.matmul %85, %86, %cst_30 {dimension_numbers = #tpu.dot_dimension_numbers<[2], [2], [1], [1], [0, 0, 0, 1, 1, 1], [0], [0]>} : vector<2x8x8xbf16>, vector<2x8x8xbf16>, vector<2x8x8xf32> -> vector<2x8x8xf32>
    "tpu.trace_stop"() : () -> ()
    %cst_31 = arith.constant dense<0xFF800000> : vector<2x8xf32>
    %88 = vector.multi_reduction <maximumf>, %87, %cst_31 [2] : vector<2x8x8xf32> to vector<2x8xf32>
    %89 = vector.shape_cast %88 : vector<2x8xf32> to vector<2x8x1xf32>
    %90 = vector.broadcast %89 : vector<2x8x1xf32> to vector<2x8x8xf32>
    %91 = arith.subf %87, %90 : vector<2x8x8xf32>
    %92 = math.exp %91 : vector<2x8x8xf32>
    %cst_32 = arith.constant dense<0.000000e+00> : vector<2x8xf32>
    %93 = vector.multi_reduction <add>, %92, %cst_32 [2] : vector<2x8x8xf32> to vector<2x8xf32>
    %94 = vector.shape_cast %93 : vector<2x8xf32> to vector<2x8x1xf32>
    %95 = tpu.reciprocal %94 {approx = true} : vector<2x8x1xf32> -> vector<2x8x1xf32>
    %96 = vector.broadcast %95 : vector<2x8x1xf32> to vector<2x8x8xf32>
    %97 = arith.mulf %92, %96 : vector<2x8x8xf32>
    %98 = arith.truncf %97 : vector<2x8x8xf32> to vector<2x8x8xbf16>
    %99 = vector.extract_strided_slice %46 {offsets = [0, 0, 16], sizes = [2, 8, 8], strides = [1, 1, 1]} : vector<2x8x32xbf16> to vector<2x8x8xbf16>
    "tpu.trace_start"() <{level = 10 : i32, message = "bqk,bkd->bqd"}> : () -> ()
    %cst_33 = arith.constant dense<0.000000e+00> : vector<2x8x8xf32>
    %100 = tpu.matmul %98, %99, %cst_33 {dimension_numbers = #tpu.dot_dimension_numbers<[2], [1], [1], [2], [0, 0, 0, 1, 1, 2], [0], [0]>} : vector<2x8x8xbf16>, vector<2x8x8xbf16>, vector<2x8x8xf32> -> vector<2x8x8xf32>
    "tpu.trace_stop"() : () -> ()
    %101 = vector.shape_cast %100 : vector<2x8x8xf32> to vector<16x8xf32>
    %102 = arith.truncf %101 : vector<16x8xf32> to vector<16x8xbf16>
    %c0_34 = arith.constant 0 : index
    %c16 = arith.constant 16 : index
    %103 = vector.load %arg18[%c0_34, %c16] : memref<16x32xbf16, #tpu.memory_space<vmem>>, vector<16x8xbf16>
    tpu.vector_store %arg18[%c0_34, %c16], %102 {strides = array<i32>} : memref<16x32xbf16, #tpu.memory_space<vmem>>, vector<16x8xbf16>,
    %104 = vector.extract_strided_slice %40 {offsets = [0, 0, 24], sizes = [2, 8, 8], strides = [1, 1, 1]} : vector<2x8x32xbf16> to vector<2x8x8xbf16>
    %105 = vector.extract_strided_slice %43 {offsets = [0, 0, 24], sizes = [2, 8, 8], strides = [1, 1, 1]} : vector<2x8x32xbf16> to vector<2x8x8xbf16>
    "tpu.trace_start"() <{level = 10 : i32, message = "bqd,bkd->bqk"}> : () -> ()
    %cst_35 = arith.constant dense<0.000000e+00> : vector<2x8x8xf32>
    %106 = tpu.matmul %104, %105, %cst_35 {dimension_numbers = #tpu.dot_dimension_numbers<[2], [2], [1], [1], [0, 0, 0, 1, 1, 1], [0], [0]>} : vector<2x8x8xbf16>, vector<2x8x8xbf16>, vector<2x8x8xf32> -> vector<2x8x8xf32>
    "tpu.trace_stop"() : () -> ()
    %cst_36 = arith.constant dense<0xFF800000> : vector<2x8xf32>
    %107 = vector.multi_reduction <maximumf>, %106, %cst_36 [2] : vector<2x8x8xf32> to vector<2x8xf32>
    %108 = vector.shape_cast %107 : vector<2x8xf32> to vector<2x8x1xf32>
    %109 = vector.broadcast %108 : vector<2x8x1xf32> to vector<2x8x8xf32>
    %110 = arith.subf %106, %109 : vector<2x8x8xf32>
    %111 = math.exp %110 : vector<2x8x8xf32>
    %cst_37 = arith.constant dense<0.000000e+00> : vector<2x8xf32>
    %112 = vector.multi_reduction <add>, %111, %cst_37 [2] : vector<2x8x8xf32> to vector<2x8xf32>
    %113 = vector.shape_cast %112 : vector<2x8xf32> to vector<2x8x1xf32>
    %114 = tpu.reciprocal %113 {approx = true} : vector<2x8x1xf32> -> vector<2x8x1xf32>
    %115 = vector.broadcast %114 : vector<2x8x1xf32> to vector<2x8x8xf32>
    %116 = arith.mulf %111, %115 : vector<2x8x8xf32>
    %117 = arith.truncf %116 : vector<2x8x8xf32> to vector<2x8x8xbf16>
    %118 = vector.extract_strided_slice %46 {offsets = [0, 0, 24], sizes = [2, 8, 8], strides = [1, 1, 1]} : vector<2x8x32xbf16> to vector<2x8x8xbf16>
    "tpu.trace_start"() <{level = 10 : i32, message = "bqk,bkd->bqd"}> : () -> ()
    %cst_38 = arith.constant dense<0.000000e+00> : vector<2x8x8xf32>
    %119 = tpu.matmul %117, %118, %cst_38 {dimension_numbers = #tpu.dot_dimension_numbers<[2], [1], [1], [2], [0, 0, 0, 1, 1, 2], [0], [0]>} : vector<2x8x8xbf16>, vector<2x8x8xbf16>, vector<2x8x8xf32> -> vector<2x8x8xf32>
    "tpu.trace_stop"() : () -> ()
    %120 = vector.shape_cast %119 : vector<2x8x8xf32> to vector<16x8xf32>
    %121 = arith.truncf %120 : vector<16x8xf32> to vector<16x8xbf16>
    %c0_39 = arith.constant 0 : index
    %c24 = arith.constant 24 : index
    %122 = vector.load %arg18[%c0_39, %c24] : memref<16x32xbf16, #tpu.memory_space<vmem>>, vector<16x8xbf16>
    tpu.vector_store %arg18[%c0_39, %c24], %121 {strides = array<i32>} : memref<16x32xbf16, #tpu.memory_space<vmem>>, vector<16x8xbf16>,
    %c0_40 = arith.constant 0 : index
    %c0_41 = arith.constant 0 : index
    %123 = vector.load %arg18[%c0_40, %c0_41] : memref<16x32xbf16, #tpu.memory_space<vmem>>, vector<16x32xbf16>
    %c0_42 = arith.constant 0 : index
    %c0_43 = arith.constant 0 : index
    %c0_44 = arith.constant 0 : index
    %124 = vector.load %arg6[%c0_42, %c0_43, %c0_44] : memref<1x32x32xbf16, #tpu.memory_space<vmem>>, vector<1x32x32xbf16>
    %125 = vector.shape_cast %124 : vector<1x32x32xbf16> to vector<32x32xbf16>
    %cst_45 = arith.constant dense<0.000000e+00> : vector<16x32xf32>
    %126 = tpu.matmul %123, %125, %cst_45 {dimension_numbers = #tpu.dot_dimension_numbers<[1], [0], [0], [1], [0, 0, 1, 1], [], []>} : vector<16x32xbf16>, vector<32x32xbf16>, vector<16x32xf32> -> vector<16x32xf32>
    %127 = arith.addf %3, %126 : vector<16x32xf32>
    %c0_46 = arith.constant 0 : index
    %c0_47 = arith.constant 0 : index
    %c0_48 = arith.constant 0 : index
    %128 = vector.load %arg7[%c0_46, %c0_47, %c0_48] : memref<1x1x32xf32, #tpu.memory_space<vmem>>, vector<1x1x32xf32>
    %129 = vector.shape_cast %128 : vector<1x1x32xf32> to vector<1x32xf32>
    %130 = vector.broadcast %129 : vector<1x32xf32> to vector<16x32xf32>
    %131 = arith.addf %127, %130 : vector<16x32xf32>
    %c0_49 = arith.constant 0 : index
    %c0_50 = arith.constant 0 : index
    %c0_51 = arith.constant 0 : index
    %132 = vector.load %arg8[%c0_49, %c0_50, %c0_51] : memref<1x1x32xf32, #tpu.memory_space<vmem>>, vector<1x1x32xf32>
    %133 = vector.shape_cast %132 : vector<1x1x32xf32> to vector<1x32xf32>
    %c0_52 = arith.constant 0 : index
    %c0_53 = arith.constant 0 : index
    %c0_54 = arith.constant 0 : index
    %134 = vector.load %arg9[%c0_52, %c0_53, %c0_54] : memref<1x1x32xf32, #tpu.memory_space<vmem>>, vector<1x1x32xf32>
    %135 = vector.shape_cast %134 : vector<1x1x32xf32> to vector<1x32xf32>
    %cst_55 = arith.constant dense<0.000000e+00> : vector<16xf32>
    %136 = vector.multi_reduction <add>, %131, %cst_55 [1] : vector<16x32xf32> to vector<16xf32>
    %137 = vector.shape_cast %136 : vector<16xf32> to vector<16x1xf32>
    %cst_56 = arith.constant 3.200000e+01 : f32
    %138 = vector.broadcast %cst_56 : f32 to vector<16x1xf32>
    %139 = arith.divf %137, %138 : vector<16x1xf32>
    %140 = vector.broadcast %139 : vector<16x1xf32> to vector<16x32xf32>
    %141 = arith.subf %131, %140 : vector<16x32xf32>
    %142 = arith.mulf %141, %141 : vector<16x32xf32>
    %cst_57 = arith.constant dense<0.000000e+00> : vector<16xf32>
    %143 = vector.multi_reduction <add>, %142, %cst_57 [1] : vector<16x32xf32> to vector<16xf32>
    %144 = vector.shape_cast %143 : vector<16xf32> to vector<16x1xf32>
    %cst_58 = arith.constant 3.200000e+01 : f32
    %145 = vector.broadcast %cst_58 : f32 to vector<16x1xf32>
    %146 = arith.divf %144, %145 : vector<16x1xf32>
    %147 = vector.broadcast %139 : vector<16x1xf32> to vector<16x32xf32>
    %148 = arith.subf %131, %147 : vector<16x32xf32>
    %cst_59 = arith.constant 9.99999974E-6 : f32
    %149 = vector.broadcast %cst_59 : f32 to vector<16x1xf32>
    %150 = arith.addf %146, %149 : vector<16x1xf32>
    %151 = math.rsqrt %150 : vector<16x1xf32>
    %152 = vector.broadcast %151 : vector<16x1xf32> to vector<16x32xf32>
    %153 = arith.mulf %148, %152 : vector<16x32xf32>
    %154 = vector.broadcast %133 : vector<1x32xf32> to vector<16x32xf32>
    %155 = arith.mulf %153, %154 : vector<16x32xf32>
    %156 = vector.broadcast %135 : vector<1x32xf32> to vector<16x32xf32>
    %157 = arith.addf %155, %156 : vector<16x32xf32>
    %158 = arith.truncf %157 : vector<16x32xf32> to vector<16x32xbf16>
    %c0_60 = arith.constant 0 : index
    %c0_61 = arith.constant 0 : index
    %c0_62 = arith.constant 0 : index
    %159 = vector.load %arg10[%c0_60, %c0_61, %c0_62] : memref<1x32x128xbf16, #tpu.memory_space<vmem>>, vector<1x32x128xbf16>
    %160 = vector.shape_cast %159 : vector<1x32x128xbf16> to vector<32x128xbf16>
    %cst_63 = arith.constant dense<0.000000e+00> : vector<16x128xf32>
    %161 = tpu.matmul %158, %160, %cst_63 {dimension_numbers = #tpu.dot_dimension_numbers<[1], [0], [0], [1], [0, 0, 1, 1], [], []>} : vector<16x32xbf16>, vector<32x128xbf16>, vector<16x128xf32> -> vector<16x128xf32>
    %c0_64 = arith.constant 0 : index
    %c0_65 = arith.constant 0 : index
    %c0_66 = arith.constant 0 : index
    %162 = vector.load %arg11[%c0_64, %c0_65, %c0_66] : memref<1x1x128xf32, #tpu.memory_space<vmem>>, vector<1x1x128xf32>
    %163 = vector.shape_cast %162 : vector<1x1x128xf32> to vector<1x128xf32>
    %164 = vector.broadcast %163 : vector<1x128xf32> to vector<16x128xf32>
    %165 = arith.addf %161, %164 : vector<16x128xf32>
    %cst_67 = arith.constant 5.000000e-01 : f32
    %166 = vector.broadcast %cst_67 : f32 to vector<16x128xf32>
    %167 = arith.mulf %166, %165 : vector<16x128xf32>
    %cst_68 = arith.constant 0.707106769 : f32
    %168 = vector.broadcast %cst_68 : f32 to vector<16x128xf32>
    %169 = arith.mulf %165, %168 : vector<16x128xf32>
    %cst_69 = arith.constant 0.000000e+00 : f32
    %170 = vector.broadcast %cst_69 : f32 to vector<16x128xf32>
    %171 = arith.cmpf oge, %169, %170 : vector<16x128xf32>
    %cst_70 = arith.constant 1.000000e+00 : f32
    %cst_71 = arith.constant -1.000000e+00 : f32
    %172 = vector.broadcast %cst_70 : f32 to vector<16x128xf32>
    %173 = vector.broadcast %cst_71 : f32 to vector<16x128xf32>
    %174 = arith.select %171, %172, %173 : vector<16x128xi1>, vector<16x128xf32>
    %175 = math.absf %169 : vector<16x128xf32>
    %cst_72 = arith.constant 0.327591091 : f32
    %176 = vector.broadcast %cst_72 : f32 to vector<16x128xf32>
    %177 = arith.mulf %176, %175 : vector<16x128xf32>
    %cst_73 = arith.constant 1.000000e+00 : f32
    %178 = vector.broadcast %cst_73 : f32 to vector<16x128xf32>
    %179 = arith.addf %178, %177 : vector<16x128xf32>
    %cst_74 = arith.constant 1.000000e+00 : f32
    %180 = vector.broadcast %cst_74 : f32 to vector<16x128xf32>
    %181 = arith.divf %180, %179 : vector<16x128xf32>
    %cst_75 = arith.constant 1.06140542 : f32
    %182 = vector.broadcast %cst_75 : f32 to vector<16x128xf32>
    %183 = arith.mulf %181, %182 : vector<16x128xf32>
    %cst_76 = arith.constant -1.45315206 : f32
    %184 = vector.broadcast %cst_76 : f32 to vector<16x128xf32>
    %185 = arith.addf %184, %183 : vector<16x128xf32>
    %186 = arith.mulf %181, %185 : vector<16x128xf32>
    %cst_77 = arith.constant 1.42141378 : f32
    %187 = vector.broadcast %cst_77 : f32 to vector<16x128xf32>
    %188 = arith.addf %187, %186 : vector<16x128xf32>
    %189 = arith.mulf %181, %188 : vector<16x128xf32>
    %cst_78 = arith.constant -0.284496725 : f32
    %190 = vector.broadcast %cst_78 : f32 to vector<16x128xf32>
    %191 = arith.addf %190, %189 : vector<16x128xf32>
    %192 = arith.mulf %181, %191 : vector<16x128xf32>
    %cst_79 = arith.constant 0.254829586 : f32
    %193 = vector.broadcast %cst_79 : f32 to vector<16x128xf32>
    %194 = arith.addf %193, %192 : vector<16x128xf32>
    %195 = arith.mulf %181, %194 : vector<16x128xf32>
    %cst_80 = arith.constant 0.000000e+00 : f32
    %196 = vector.broadcast %cst_80 : f32 to vector<16x128xf32>
    %197 = arith.subf %196, %175 : vector<16x128xf32>
    %198 = arith.mulf %197, %175 : vector<16x128xf32>
    %199 = math.exp %198 : vector<16x128xf32>
    %200 = arith.mulf %195, %199 : vector<16x128xf32>
    %cst_81 = arith.constant 1.000000e+00 : f32
    %201 = vector.broadcast %cst_81 : f32 to vector<16x128xf32>
    %202 = arith.subf %201, %200 : vector<16x128xf32>
    %203 = arith.mulf %174, %202 : vector<16x128xf32>
    %cst_82 = arith.constant 1.000000e+00 : f32
    %204 = vector.broadcast %cst_82 : f32 to vector<16x128xf32>
    %205 = arith.addf %204, %203 : vector<16x128xf32>
    %206 = arith.mulf %167, %205 : vector<16x128xf32>
    %207 = arith.truncf %206 : vector<16x128xf32> to vector<16x128xbf16>
    %c0_83 = arith.constant 0 : index
    %c0_84 = arith.constant 0 : index
    %c0_85 = arith.constant 0 : index
    %208 = vector.load %arg12[%c0_83, %c0_84, %c0_85] : memref<1x128x32xbf16, #tpu.memory_space<vmem>>, vector<1x128x32xbf16>
    %209 = vector.shape_cast %208 : vector<1x128x32xbf16> to vector<128x32xbf16>
    %cst_86 = arith.constant dense<0.000000e+00> : vector<16x32xf32>
    %210 = tpu.matmul %207, %209, %cst_86 {dimension_numbers = #tpu.dot_dimension_numbers<[1], [0], [0], [1], [0, 0, 1, 1], [], []>} : vector<16x128xbf16>, vector<128x32xbf16>, vector<16x32xf32> -> vector<16x32xf32>
    %211 = arith.addf %131, %210 : vector<16x32xf32>
    %c0_87 = arith.constant 0 : index
    %c0_88 = arith.constant 0 : index
    %c0_89 = arith.constant 0 : index
    %212 = vector.load %arg13[%c0_87, %c0_88, %c0_89] : memref<1x1x32xf32, #tpu.memory_space<vmem>>, vector<1x1x32xf32>
    %213 = vector.shape_cast %212 : vector<1x1x32xf32> to vector<1x32xf32>
    %214 = vector.broadcast %213 : vector<1x32xf32> to vector<16x32xf32>
    %215 = arith.addf %211, %214 : vector<16x32xf32>
    %c0_90 = arith.constant 0 : index
    %c0_91 = arith.constant 0 : index
    %216 = vector.load %arg17[%c0_90, %c0_91] : memref<16x32xf32, #tpu.memory_space<vmem>>, vector<16x32xf32>
    tpu.vector_store %arg17[%c0_90, %c0_91], %215 {strides = array<i32>} : memref<16x32xf32, #tpu.memory_space<vmem>>, vector<16x32xf32>,
    %c1_i32 = arith.constant 1 : i32
    %217 = arith.cmpi eq, %arg0, %c1_i32 : i32
    %218 = arith.extui %217 : i1 to i32
    %c0_i32_92 = arith.constant 0 : i32
    %219 = arith.cmpi ne, %218, %c0_i32_92 : i32
    scf.if %219 {
      %c0_93 = arith.constant 0 : index
      %c0_94 = arith.constant 0 : index
      %220 = vector.load %arg17[%c0_93, %c0_94] : memref<16x32xf32, #tpu.memory_space<vmem>>, vector<16x32xf32>
      %c0_95 = arith.constant 0 : index
      %c0_96 = arith.constant 0 : index
      %221 = vector.load %arg14[%c0_95, %c0_96] : memref<1x32xf32, #tpu.memory_space<vmem>>, vector<1x32xf32>
      %c0_97 = arith.constant 0 : index
      %c0_98 = arith.constant 0 : index
      %222 = vector.load %arg15[%c0_97, %c0_98] : memref<1x32xf32, #tpu.memory_space<vmem>>, vector<1x32xf32>
      %cst_99 = arith.constant dense<0.000000e+00> : vector<16xf32>
      %223 = vector.multi_reduction <add>, %220, %cst_99 [1] : vector<16x32xf32> to vector<16xf32>
      %224 = vector.shape_cast %223 : vector<16xf32> to vector<16x1xf32>
      %cst_100 = arith.constant 3.200000e+01 : f32
      %225 = vector.broadcast %cst_100 : f32 to vector<16x1xf32>
      %226 = arith.divf %224, %225 : vector<16x1xf32>
      %227 = vector.broadcast %226 : vector<16x1xf32> to vector<16x32xf32>
      %228 = arith.subf %220, %227 : vector<16x32xf32>
      %229 = arith.mulf %228, %228 : vector<16x32xf32>
      %cst_101 = arith.constant dense<0.000000e+00> : vector<16xf32>
      %230 = vector.multi_reduction <add>, %229, %cst_101 [1] : vector<16x32xf32> to vector<16xf32>
      %231 = vector.shape_cast %230 : vector<16xf32> to vector<16x1xf32>
      %cst_102 = arith.constant 3.200000e+01 : f32
      %232 = vector.broadcast %cst_102 : f32 to vector<16x1xf32>
      %233 = arith.divf %231, %232 : vector<16x1xf32>
      %234 = vector.broadcast %226 : vector<16x1xf32> to vector<16x32xf32>
      %235 = arith.subf %220, %234 : vector<16x32xf32>
      %cst_103 = arith.constant 9.99999974E-6 : f32
      %236 = vector.broadcast %cst_103 : f32 to vector<16x1xf32>
      %237 = arith.addf %233, %236 : vector<16x1xf32>
      %238 = math.rsqrt %237 : vector<16x1xf32>
      %239 = vector.broadcast %238 : vector<16x1xf32> to vector<16x32xf32>
      %240 = arith.mulf %235, %239 : vector<16x32xf32>
      %241 = vector.broadcast %221 : vector<1x32xf32> to vector<16x32xf32>
      %242 = arith.mulf %240, %241 : vector<16x32xf32>
      %243 = vector.broadcast %222 : vector<1x32xf32> to vector<16x32xf32>
      %244 = arith.addf %242, %243 : vector<16x32xf32>
      %c0_104 = arith.constant 0 : index
      %c0_105 = arith.constant 0 : index
      %245 = vector.load %arg16[%c0_104, %c0_105] : memref<16x32xf32, #tpu.memory_space<vmem>>, vector<16x32xf32>
      tpu.vector_store %arg16[%c0_104, %c0_105], %244 {strides = array<i32>} : memref<16x32xf32, #tpu.memory_space<vmem>>, vector<16x32xf32>,
    } else {
    }
    return
  }
  func.func @transform_0(%arg0: i32) -> (i32, i32) {
    %c0_i32 = arith.constant 0 : i32
    %c0_i32_0 = arith.constant 0 : i32
    %c0_i32_1 = arith.constant 0 : i32
    return %c0_i32, %c0_i32_0 : i32, i32
  }
  func.func @transform_1(%arg0: i32) -> (i32, i32, i32) {
    %c0_i32 = arith.constant 0 : i32
    %c0_i32_0 = arith.constant 0 : i32
    %c0_i32_1 = arith.constant 0 : i32
    return %arg0, %c0_i32, %c0_i32_0 : i32, i32, i32
  }
  func.func @transform_2(%arg0: i32) -> (i32, i32, i32) {
    %c0_i32 = arith.constant 0 : i32
    %c0_i32_0 = arith.constant 0 : i32
    %c0_i32_1 = arith.constant 0 : i32
    return %arg0, %c0_i32, %c0_i32_0 : i32, i32, i32
  }
  func.func @transform_3(%arg0: i32) -> (i32, i32, i32) {
    %c0_i32 = arith.constant 0 : i32
    %c0_i32_0 = arith.constant 0 : i32
    %c0_i32_1 = arith.constant 0 : i32
    return %arg0, %c0_i32, %c0_i32_0 : i32, i32, i32
  }
  func.func @transform_4(%arg0: i32) -> (i32, i32, i32) {
    %c0_i32 = arith.constant 0 : i32
    %c0_i32_0 = arith.constant 0 : i32
    %c0_i32_1 = arith.constant 0 : i32
    return %arg0, %c0_i32, %c0_i32_0 : i32, i32, i32
  }
  func.func @transform_5(%arg0: i32) -> (i32, i32, i32) {
    %c0_i32 = arith.constant 0 : i32
    %c0_i32_0 = arith.constant 0 : i32
    %c0_i32_1 = arith.constant 0 : i32
    return %arg0, %c0_i32, %c0_i32_0 : i32, i32, i32
  }
  func.func @transform_6(%arg0: i32) -> (i32, i32, i32) {
    %c0_i32 = arith.constant 0 : i32
    %c0_i32_0 = arith.constant 0 : i32
    %c0_i32_1 = arith.constant 0 : i32
    return %arg0, %c0_i32, %c0_i32_0 : i32, i32, i32
  }
  func.func @transform_7(%arg0: i32) -> (i32, i32, i32) {
    %c0_i32 = arith.constant 0 : i32
    %c0_i32_0 = arith.constant 0 : i32
    %c0_i32_1 = arith.constant 0 : i32
    return %arg0, %c0_i32, %c0_i32_0 : i32, i32, i32
  }
  func.func @transform_8(%arg0: i32) -> (i32, i32, i32) {
    %c0_i32 = arith.constant 0 : i32
    %c0_i32_0 = arith.constant 0 : i32
    %c0_i32_1 = arith.constant 0 : i32
    return %arg0, %c0_i32, %c0_i32_0 : i32, i32, i32
  }
  func.func @transform_9(%arg0: i32) -> (i32, i32, i32) {
    %c0_i32 = arith.constant 0 : i32
    %c0_i32_0 = arith.constant 0 : i32
    %c0_i32_1 = arith.constant 0 : i32
    return %arg0, %c0_i32, %c0_i32_0 : i32, i32, i32
  }
  func.func @transform_10(%arg0: i32) -> (i32, i32, i32) {
    %c0_i32 = arith.constant 0 : i32
    %c0_i32_0 = arith.constant 0 : i32
    %c0_i32_1 = arith.constant 0 : i32
    return %arg0, %c0_i32, %c0_i32_0 : i32, i32, i32
  }
  func.func @transform_11(%arg0: i32) -> (i32, i32, i32) {
    %c0_i32 = arith.constant 0 : i32
    %c0_i32_0 = arith.constant 0 : i32
    %c0_i32_1 = arith.constant 0 : i32
    return %arg0, %c0_i32, %c0_i32_0 : i32, i32, i32
  }
  func.func @transform_12(%arg0: i32) -> (i32, i32, i32) {
    %c0_i32 = arith.constant 0 : i32
    %c0_i32_0 = arith.constant 0 : i32
    %c0_i32_1 = arith.constant 0 : i32
    return %arg0, %c0_i32, %c0_i32_0 : i32, i32, i32
  }
  func.func @transform_13(%arg0: i32) -> (i32, i32) {
    %c0_i32 = arith.constant 0 : i32
    %c0_i32_0 = arith.constant 0 : i32
    %c0_i32_1 = arith.constant 0 : i32
    return %c0_i32, %c0_i32_0 : i32, i32
  }
  func.func @transform_14(%arg0: i32) -> (i32, i32) {
    %c0_i32 = arith.constant 0 : i32
    %c0_i32_0 = arith.constant 0 : i32
    %c0_i32_1 = arith.constant 0 : i32
    return %c0_i32, %c0_i32_0 : i32, i32
  }
  func.func @transform_15(%arg0: i32) -> (i32, i32) {
    %c0_i32 = arith.constant 0 : i32
    %c0_i32_0 = arith.constant 0 : i32
    %c0_i32_1 = arith.constant 0 : i32
    return %c0_i32, %c0_i32_0 : i32, i32
  }
}

</mosaic_0001>

<bundles_post_ra>
// kernel: _lambda_.2
= control target key start
LH: loop header
LB: loop body
LE: loop exit
PB: predicated region body
PF: predicated region fallthrough
CT: control target
= control target key end

     0   :  { %s926_s24 = smov 0   ;;  %s1032_s0 = inlined_call_operand.vmem [shape: f32[2,9,8], index: 0, kind: input, shape index: {}]   ;;  %s1033_s1 = inlined_call_operand.vmem [shape: f32[2,9,8], index: 1, kind: input, shape index: {}]   ;;  %s1034_s2 = inlined_call_operand.vmem [shape: bf16[3,8,32], index: 2, kind: input, shape index: {}]   ;;  %s1035_s3 = inlined_call_operand.vmem [shape: f32[1,32], index: 3, kind: input, shape index: {}]   ;;  %s1036_s4 = inlined_call_operand.vmem [shape: bf16[3,32,32], index: 4, kind: input, shape index: {}]   ;;  %s1037_s5 = inlined_call_operand.vmem [shape: f32[1,32], index: 5, kind: input, shape index: {}]   ;;  %s1038_s6 = inlined_call_operand.vmem [shape: f32[8,32], index: 6, kind: input, shape index: {}]   ;;  %s1039_s7 = inlined_call_operand.vmem [shape: f32[2,8,32], index: 7, kind: output, shape index: {}]  }
   0x1 LB: > { %s787_s25 = sadd.s32 4294967295, %s883_s24   ;;  %p791_p0 = scmp.ge.s32.totalorder %s883_s24, 1  ;;  %s883_s24 = sphi %s926_s24, %s17_s24  }
   0x2   : > { %p247_p1 = scmp.lt.s32.totalorder %s883_s24, 3 }
   0x4   : > { %p248_p2 = pnand %p791_p0, %p247_p1 }
   0x5   : > { %p283_p3 = scmp.lt.s32.totalorder (!%p248_p2), %s787_s25, 1 }
   0x6   : > { %251 = sbr.rel (%p248_p2) target bundleno = 416 (0x1a0), region = 48 }
   0xb   : > { %v797_v0 = vld [vmem:[%s1034_s2 + $0x4] sm:$0xf]  ;;  %vm313_vm0 = vcmask 1043456   ;;  %v306_v1 = vld [vmem:[%s1034_s2] sm:$0xf]  ;;  %s1041_s25 = smov (!%p283_p3, %s787_s25), 1 }
   0xc   : > { %v315_v2 = vsel %vm313_vm0, %v797_v0, 0  ;;  %v334_v3 = vsel %vm313_vm0, %v306_v1, 0  ;;  %v800_v4 = vld [vmem:[%s1034_s2 + $0x8] sm:$0xf]  ;;  %s842_s9 = sshll.u32 %s1041_s25, 4  ;;  %vm309_vm1 = vcmask 64512  }
   0xd   : > { %324 = vmatpush.bf16.msra.mxu0 %v315_v2  ;;  %343 = vmatpush.bf16.msra.mxu1 %v334_v3  ;;  %v367_v5 = vsel %vm313_vm0, %v800_v4, 0  ;;  %s292_s12 = scalar_lea.vmem %s1033_s1, %s842_s9  ;;  %s287_s15 = scalar_lea.vmem %s1032_s0, %s842_s9  ;;  %v859_v33 = vld [vmem:[%s1035_s3] ss:$0 sm:$0xff]  ;;  %v845_v57 = vld [vmem:[%s1036_s4 + $0x18] sm:$0xff]  ;;  %v847_v62 = vld [vmem:[%s1036_s4 + $0x28] sm:$0xff]  ;;  %vm548_vm12 = vcmask 261120  }
   0xe   : > { %376 = vmatpush.bf16.msra.mxu2 %v367_v5  ;;  %395 = vmatpush.bf16.msra.mxu3 %v315_v2  ;;  %v302_v6 = vld [vmem:[%s292_s12] sm:$0xff]  ;;  %v303_v7 = vld [vmem:[%s292_s12 + $0x8] sm:$0x1]  ;;  %v844_v2 = vld [vmem:[%s1036_s4 + $0x10] sm:$0xff]  ;;  %s796_s11 = sshll.u32 %s1041_s25, 3 }
   0xf   : > { %v304_v8 = vpack.c.bf16 %v302_v6, %v302_v6  ;;  %v305_v9 = vpack.c.bf16 %v303_v7, %v303_v7  ;;  %v298_v10 = vld [vmem:[%s287_s15] sm:$0xff]  ;;  %v299_v11 = vld [vmem:[%s287_s15 + $0x8] sm:$0x1]  ;;  %s296_s25 = scalar_lea.vmem %s1039_s7, %s796_s11 }
  0x10   : > { %v300_v12 = vpack.c.bf16 %v298_v10, %v298_v10  ;;  %v301_v13 = vpack.c.bf16 %v299_v11, %v299_v11  ;;  %v849_v63 = vld [vmem:[%s1036_s4 + $0x8] sm:$0xff]  ;;  %v846_v7 = vld [vmem:[%s1036_s4 + $0x20] sm:$0xff] }
  0x11   : > { %408 = vmatpush.bf16.msrb.mxu0 %v334_v3  ;;  %436 = vmatpush.bf16.msrb.mxu1 %v367_v5  ;;  %v416_v14 = vunpack.c.l.b16 %v304_v8  ;;  %v417_v15 = vunpack.c.l.b16 %v305_v9 }
  0x12   : > { %798 = vmatmul.msk.bf16.vlgmr.msra.gmra.mxu0 %vm309_vm1, %v304_v8  ;;  %799 = vmatmul.msk.bf16.vlgmr.msra.gmra.mxu1 %vm309_vm1, %v300_v12  ;;  %v353_v16 = vunpack.c.l.b16 %v300_v12  ;;  %v354_v17 = vunpack.c.l.b16 %v301_v13 }
  0x13   : > { %v418_v18 = vpack.c.b16 %v417_v15, %v416_v14  ;;  %586 = vmatpush.bf16.msrb.mxu3 %v845_v57  ;;  %558 = vmatpush.bf16.msrb.mxu2 %v847_v62 }
  0x14   : > { %v355_v19 = vpack.c.b16 %v354_v17, %v353_v16 }
  0x15   : > { %v422_v22 = vshll.u32 %v418_v18, 16  ;;  %v420_v25 = vshrl.u32 %v418_v18, 16  ;;  %620 = vmatpush.bf16.msra.mxu0 %v849_v63 }
  0x16   : > { %v357_v20 = vshrl.u32 %v355_v19, 16  ;;  %v359_v21 = vshll.u32 %v355_v19, 16 }
  0x17   : > { %v424_v26 = vrot.slane %v422_v22, 1  ;;  %587 = vmatpush.bf16.msrb.mxu3 %v844_v2  ;;  %559 = vmatpush.bf16.msrb.mxu2 %v846_v7 }
  0x18   : > { %v361_v23 = vrot.slane %v359_v21, 1 }
  0x19   : > { %v425_v27 = vor.u32 %v424_v26, %v420_v25 }
  0x1a   : > { %v362_v24 = vor.u32 %v361_v23, %v357_v20 }
  0x1c   : > { %801 = vmatmul.msk.bf16.vlgmr.msra.gmra.mxu2 %vm309_vm1, %v362_v24  ;;  %802 = vmatmul.msk.bf16.vlgmr.msra.gmra.mxu3 %vm309_vm1, %v362_v24 }
  0x22   : > { %803 = vmatmul.msk.bf16.vlgmr.msrb.gmra.mxu0 %vm309_vm1, %v304_v8  ;;  %804 = vmatmul.msk.bf16.vlgmr.msrb.gmra.mxu1 %vm309_vm1, %v425_v27  ;;  %v848_v8 = vld [vmem:[%s1036_s4] sm:$0xff] }
  0x23   : > { %621 = vmatpush.bf16.msra.mxu0 %v848_v8 }
  0x8f   : > { %v326_v28 = vpop.f32.mrf.mxu0  ;;  %v345_v29 = vpop.f32.mrf.mxu1 }
  0x90   : > { %v346_v32 = vadd.f32 %v345_v29, %v326_v28 }
  0x97   : > { %v328_v30 = vpop.f32.mrf.mxu0  ;;  %v347_v31 = vpop.f32.mrf.mxu1 }
  0x9f   : > { %v410_v34 = vpop.f32.mrf.mxu0  ;;  %v378_v35 = vpop.f32.mrf.mxu2 }
  0xa0   : > { %v397_v36 = vpop.f32.mrf.mxu3  ;;  %v382_v37 = vadd.f32 %v378_v35, %v346_v32  ;;  %v438_v39 = vpop.f32.mrf.mxu1 }
  0xa1   : > { %v411_v38 = vadd.f32 %v410_v34, %v397_v36 }
  0xa2   : > { %v961_v40 = vadd.f32 %v859_v33, %v382_v37 }
  0xa3   : > { %v442_v41 = vadd.f32 %v438_v39, %v411_v38 }
  0xa4   : > { %v964_v42 = vmul.f32 0.70710677, %v961_v40 }
  0xa5   : > { %v966_v43 = vadd.f32 %v859_v33, %v442_v41 }
  0xa6   : > { %v448_v44 = vand.u32 2147483647, %v964_v42  ;;  %vm446_vm10 = vcmp.ge.f32.partialorder %v964_v42, 0.0 }
  0xa7   : > { %v970_v45 = vmul.f32 0.70710677, %v966_v43  ;;  %v412_v46 = vpop.f32.mrf.mxu0  ;;  %v380_v47 = vpop.f32.mrf.mxu2 }
  0xa8   : > { %v399_v48 = vpop.f32.mrf.mxu3  ;;  %v449_v49 = vmul.f32 0.3275911, %v448_v44  ;;  %v440_v51 = vpop.f32.mrf.mxu1  ;;  %v475_v13 = vsub.f32 0.0, %v448_v44 }
  0xa9   : > { %v489_v50 = vand.u32 2147483647, %v970_v45  ;;  %vm487_vm11 = vcmp.ge.f32.partialorder %v970_v45, 0.0 }
  0xaa   : > { %v450_v52 = vadd.f32 1.0, %v449_v49  ;;  %v476_v19 = vmul.f32 %v475_v13, %v448_v44  ;;  %v885_v49 = vmov -1.0  }
  0xab   : > { %v490_v53 = vmul.f32 0.3275911, %v489_v50  ;;  %v516_v21 = vsub.f32 0.0, %v489_v50 }
  0xac   : > { %861 = vrcp.f32 %v450_v52  ;;  %v460_v60 = vand.u32 2147483647, %v450_v52  ;;  %v462_v61 = vand.u32 2147483648, %v450_v52  ;;  %vm456_vm3 = vweird.f32 %v450_v52 }
  0xad   : > { %v491_v54 = vadd.f32 1.0, %v490_v53  ;;  %v477_v26 = vmul.f32 1.442695, %v476_v19  ;;  %v517_v27 = vmul.f32 %v516_v21, %v489_v50  ;;  %v447_v50 = vsel %vm446_vm10, 1.0, %v885_v49 }
  0xae   : > { %vm461_vm5 = vcmp.eq.f32.partialorder %v460_v60, 8.507059e+37  ;;  %v463_v5 = vor.u32 1.1754944e-38, %v462_v61  ;;  %v444_v53 = vmul.f32 0.5, %v961_v40  ;;  %v860_v40 = vld [vmem:[%s1037_s5] ss:$0 sm:$0xff] }
  0xaf   : > { %863 = vrcp.f32 %v491_v54  ;;  %v503_v6 = vand.u32 2147483648, %v491_v54  ;;  %v501_v11 = vand.u32 2147483647, %v491_v54  ;;  %vm497_vm7 = vweird.f32 %v491_v54 }
  0xb0   : > { %865 = vpow2.f32 %v477_v26  ;;  %v518_v32 = vmul.f32 1.442695, %v517_v27 }
  0xb1   : > { %v504_v16 = vor.u32 1.1754944e-38, %v503_v6  ;;  %vm502_vm9 = vcmp.eq.f32.partialorder %v501_v11, 8.507059e+37 }
  0xb2   : > { %v862_v55 = vpop.eup %861  ;;  %867 = vpow2.f32 %v518_v32 }
  0xb3   : > { %v452_v56 = vmul.f32 %v862_v55, %v450_v52  ;;  %vm457_vm2 = vweird.f32 %v862_v55 }
  0xb4   : > { %vm458_vm4 = vmor %vm456_vm3, %vm457_vm2 }
  0xb5   : > { %v453_v58 = vsub.f32 1.0, %v452_v56  ;;  %v864_v59 = vpop.eup %863  ;;  %v488_v56 = vsel %vm487_vm11, 1.0, %v885_v49 }
  0xb6   : > { %v493_v1 = vmul.f32 %v864_v59, %v491_v54  ;;  %vm498_vm6 = vweird.f32 %v864_v59  ;;  %v866_v39 = vpop.eup %865 }
  0xb7   : > { %v454_v0 = vmul.f32 %v862_v55, %v453_v58  ;;  %vm499_vm8 = vmor %vm497_vm7, %vm498_vm6  ;;  %vm669_vm7 = vcmask 253952  }
  0xb8   : > { %v494_v4 = vsub.f32 1.0, %v493_v1  ;;  %v868_v48 = vpop.eup %867 }
  0xb9   : > { %v455_v3 = vadd.f32 %v862_v55, %v454_v0 }
  0xba   : > { %v495_v10 = vmul.f32 %v864_v59, %v494_v4 }
  0xbb   : > { %v459_v9 = vsel %vm458_vm4, %v862_v55, %v455_v3 }
  0xbc   : > { %v464_v12 = vsel %vm461_vm5, %v463_v5, %v459_v9  ;;  %v496_v15 = vadd.f32 %v864_v59, %v495_v10 }
  0xbd   : > { %v466_v14 = vmul.f32 1.0614054, %v464_v12 }
  0xbe   : > { %v500_v18 = vsel %vm499_vm8, %v864_v59, %v496_v15  ;;  %v485_v59 = vmul.f32 0.5, %v966_v43  ;;  %vm720_vm8 = vcmask 261121  }
  0xbf   : > { %v467_v17 = vadd.f32 -1.4531521, %v466_v14  ;;  %v505_v20 = vsel %vm502_vm9, %v504_v16, %v500_v18 }
  0xc0   : > { %v507_v23 = vmul.f32 1.0614054, %v505_v20 }
  0xc1   : > { %v468_v22 = vmul.f32 %v467_v17, %v464_v12 }
  0xc2   : > { %v508_v25 = vadd.f32 -1.4531521, %v507_v23 }
  0xc3   : > { %v469_v24 = vadd.f32 1.4214138, %v468_v22 }
  0xc4   : > { %v509_v29 = vmul.f32 %v508_v25, %v505_v20 }
  0xc5   : > { %v470_v28 = vmul.f32 %v469_v24, %v464_v12 }
  0xc6   : > { %v510_v31 = vadd.f32 1.4214138, %v509_v29 }
  0xc7   : > { %v471_v30 = vadd.f32 -0.28449672, %v470_v28 }
  0xc8   : > { %v511_v34 = vmul.f32 %v510_v31, %v505_v20 }
  0xc9   : > { %v472_v33 = vmul.f32 %v471_v30, %v464_v12 }
  0xca   : > { %v512_v36 = vadd.f32 -0.28449672, %v511_v34 }
  0xcb   : > { %v473_v35 = vadd.f32 0.2548296, %v472_v33 }
  0xcc   : > { %v513_v38 = vmul.f32 %v512_v36, %v505_v20 }
  0xcd   : > { %v474_v37 = vmul.f32 %v473_v35, %v464_v12 }
  0xce   : > { %v514_v44 = vadd.f32 0.2548296, %v513_v38 }
  0xcf   : > { %v479_v41 = vmul.f32 %v866_v39, %v474_v37 }
  0xd0   : > { %v515_v47 = vmul.f32 %v514_v44, %v505_v20 }
  0xd1   : > { %v480_v46 = vsub.f32 1.0, %v479_v41 }
  0xd2   : > { %v520_v52 = vmul.f32 %v868_v48, %v515_v47 }
  0xd3   : > { %v481_v51 = vmul.f32 %v480_v46, %v447_v50 }
  0xd4   : > { %v521_v55 = vsub.f32 1.0, %v520_v52 }
  0xd5   : > { %v482_v54 = vadd.f32 1.0, %v481_v51 }
  0xd6   : > { %v522_v42 = vmul.f32 %v521_v55, %v488_v56 }
  0xd7   : > { %v483_v57 = vmul.f32 %v482_v54, %v444_v53 }
  0xd8   : > { %v523_v60 = vadd.f32 1.0, %v522_v42 }
  0xd9   : > { %v484_v58 = vpack.c.bf16 %v483_v57, %v483_v57 }
  0xda   : > { %v524_v61 = vmul.f32 %v523_v60, %v485_v59 }
  0xdb   : > { %830 = vmatmul.msk.bf16.vlgmr.msrb.gmra.mxu3 %vm548_vm12, %v484_v58 }
  0xdc   : > { %v525_v62 = vpack.c.bf16 %v524_v61, %v524_v61 }
  0xde   : > { %821 = vmatmul.msk.bf16.vlgmr.msrb.gmra.mxu2 %vm548_vm12, %v525_v62  ;;  %839 = vmatmul.msk.bf16.vlgmr.msra.gmra.mxu0 %vm548_vm12, %v525_v62 }
 0x15b   : > { %v623_v45 = vpop.f32.mrf.mxu0 }
 0x15c   : > { %v672_v3 = vrot.slane %v623_v45, 7 }
 0x15e   : > { %v589_v63 = vpop.f32.mrf.mxu3 }
 0x161   : > { %v561_v0 = vpop.f32.mrf.mxu2 }
 0x162   : > { %v590_v1 = vadd.f32 %v589_v63, %v561_v0 }
 0x163   : > { %v625_v2 = vpop.f32.mrf.mxu0 }
 0x164   : > { %v1000_v4 = vadd.f32 %v860_v40, %v590_v1 }
 0x166   : > { %v591_v5 = vpop.f32.mrf.mxu3  ;;  %v1003_v43 = vmul.f32 0.70710677, %v1000_v4  ;;  %v1006_v6 = vadd.f32 %v672_v3, %v1000_v4 }
 0x167   : > { %v627_v5 = vmul.f32 0.5, %v1000_v4 }
 0x168   : > { %v631_v7 = vand.u32 2147483647, %v1003_v43  ;;  %v1010_v8 = vmul.f32 0.70710677, %v1006_v6  ;;  %vm629_vm5 = vcmp.ge.f32.partialorder %v1003_v43, 0.0 }
 0x169   : > { %v563_v9 = vpop.f32.mrf.mxu2  ;;  %v630_v1 = vsel %vm629_vm5, 1.0, %v885_v49  ;;  %v667_v43 = vld [vmem:[%s1038_s6] sm:$0x1] }
 0x16a   : > { %v632_v10 = vmul.f32 0.3275911, %v631_v7  ;;  %v679_v11 = vand.u32 2147483647, %v1010_v8  ;;  %v658_v31 = vsub.f32 0.0, %v631_v7  ;;  %vm677_vm6 = vcmp.ge.f32.partialorder %v1010_v8, 0.0 }
 0x16b   : > { %v675_v8 = vmul.f32 0.5, %v1006_v6 }
 0x16c   : > { %v633_v12 = vadd.f32 1.0, %v632_v10  ;;  %v680_v13 = vmul.f32 0.3275911, %v679_v11  ;;  %v659_v37 = vmul.f32 %v658_v31, %v631_v7  ;;  %v706_v39 = vsub.f32 0.0, %v679_v11 }
 0x16d   : > { %v678_v10 = vsel %vm677_vm6, 1.0, %v885_v49 }
 0x16e   : > { %869 = vrcp.f32 %v633_v12  ;;  %v681_v14 = vadd.f32 1.0, %v680_v13  ;;  %v643_v19 = vand.u32 2147483647, %v633_v12  ;;  %v645_v20 = vand.u32 2147483648, %v633_v12 }
 0x16f   : > { %vm639_vm14 = vweird.f32 %v633_v12  ;;  %v660_v48 = vmul.f32 1.442695, %v659_v37  ;;  %v707_v50 = vmul.f32 %v706_v39, %v679_v11  ;;  %v715_v11 = vld [vmem:[%s1038_s6 + $0x1] sm:$0x7f] }
 0x170   : > { %871 = vrcp.f32 %v681_v14  ;;  %vm644_vm0 = vcmp.eq.f32.partialorder %v643_v19, 8.507059e+37  ;;  %v646_v25 = vor.u32 1.1754944e-38, %v645_v20  ;;  %v693_v26 = vand.u32 2147483648, %v681_v14 }
 0x171   : > { %v691_v29 = vand.u32 2147483647, %v681_v14  ;;  %vm687_vm2 = vweird.f32 %v681_v14  ;;  %873 = vpow2.f32 %v660_v48  ;;  %v708_v55 = vmul.f32 1.442695, %v707_v50 }
 0x172   : > { %v694_v34 = vor.u32 1.1754944e-38, %v693_v26 }
 0x173   : > { %vm692_vm4 = vcmp.eq.f32.partialorder %v691_v29, 8.507059e+37  ;;  %875 = vpow2.f32 %v708_v55 }
 0x174   : > { %v870_v15 = vpop.eup %869 }
 0x175   : > { %v635_v16 = vmul.f32 %v870_v15, %v633_v12  ;;  %vm640_vm13 = vweird.f32 %v870_v15 }
 0x176   : > { %v872_v18 = vpop.eup %871  ;;  %vm641_vm15 = vmor %vm639_vm14, %vm640_vm13 }
 0x177   : > { %v636_v17 = vsub.f32 1.0, %v635_v16  ;;  %v683_v22 = vmul.f32 %v872_v18, %v681_v14  ;;  %vm688_vm1 = vweird.f32 %v872_v18  ;;  %v874_v61 = vpop.eup %873 }
 0x178   : > { %vm689_vm3 = vmor %vm687_vm2, %vm688_vm1 }
 0x179   : > { %v637_v21 = vmul.f32 %v870_v15, %v636_v17  ;;  %v684_v24 = vsub.f32 1.0, %v683_v22  ;;  %v876_v0 = vpop.eup %875 }
 0x17b   : > { %v638_v23 = vadd.f32 %v870_v15, %v637_v21  ;;  %v685_v28 = vmul.f32 %v872_v18, %v684_v24 }
 0x17d   : > { %v642_v27 = vsel %vm641_vm15, %v870_v15, %v638_v23  ;;  %v686_v33 = vadd.f32 %v872_v18, %v685_v28  ;;  %v717_v15 = vrot.slane %v715_v11, 7 }
 0x17e   : > { %v647_v30 = vsel %vm644_vm0, %v646_v25, %v642_v27 }
 0x17f   : > { %v649_v32 = vmul.f32 1.0614054, %v647_v30  ;;  %v690_v36 = vsel %vm689_vm3, %v872_v18, %v686_v33 }
 0x180   : > { %v695_v38 = vsel %vm692_vm4, %v694_v34, %v690_v36 }
 0x181   : > { %v650_v35 = vadd.f32 -1.4531521, %v649_v32  ;;  %v697_v44 = vmul.f32 1.0614054, %v695_v38 }
 0x183   : > { %v651_v41 = vmul.f32 %v650_v35, %v647_v30  ;;  %v698_v47 = vadd.f32 -1.4531521, %v697_v44 }
 0x185   : > { %v652_v46 = vadd.f32 1.4214138, %v651_v41  ;;  %v699_v52 = vmul.f32 %v698_v47, %v695_v38 }
 0x187   : > { %v653_v51 = vmul.f32 %v652_v46, %v647_v30  ;;  %v700_v54 = vadd.f32 1.4214138, %v699_v52 }
 0x189   : > { %v654_v53 = vadd.f32 -0.28449672, %v653_v51  ;;  %v701_v57 = vmul.f32 %v700_v54, %v695_v38 }
 0x18b   : > { %v655_v56 = vmul.f32 %v654_v53, %v647_v30  ;;  %v702_v58 = vadd.f32 -0.28449672, %v701_v57 }
 0x18d   : > { %v656_v42 = vadd.f32 0.2548296, %v655_v56  ;;  %v703_v60 = vmul.f32 %v702_v58, %v695_v38 }
 0x18f   : > { %v657_v59 = vmul.f32 %v656_v42, %v647_v30  ;;  %v704_v45 = vadd.f32 0.2548296, %v703_v60 }
 0x191   : > { %v662_v62 = vmul.f32 %v874_v61, %v657_v59  ;;  %v705_v40 = vmul.f32 %v704_v45, %v695_v38 }
 0x193   : > { %v663_v63 = vsub.f32 1.0, %v662_v62  ;;  %v710_v3 = vmul.f32 %v876_v0, %v705_v40 }
 0x195   : > { %v664_v2 = vmul.f32 %v663_v63, %v630_v1  ;;  %v711_v9 = vsub.f32 1.0, %v710_v3 }
 0x197   : > { %v665_v7 = vadd.f32 1.0, %v664_v2  ;;  %v712_v13 = vmul.f32 %v711_v9, %v678_v10 }
 0x199   : > { %v666_v12 = vmul.f32 %v665_v7, %v627_v5  ;;  %v713_v14 = vadd.f32 1.0, %v712_v13 }
 0x19b   : > { %v668_v4 = vadd.f32 %v667_v43, %v666_v12  ;;  %v714_v16 = vmul.f32 %v713_v14, %v675_v8 }
 0x19d   : > { %670 = vst.msk [vmem:[%s296_s25] sm:$0x1] %vm669_vm7, %v668_v4  ;;  %v719_v49 = vadd.f32 %v717_v15, %v714_v16 }
 0x19f   : > { %721 = vst.msk [vmem:[%s296_s25] sm:$0xfe] %vm720_vm8, %v719_v49 }
 0x1a0 PF: > { %s17_s24 = sadd.s32 1, %s883_s24  }
 0x1a1   : > { %p14_p4 = scmp.ge.s32.totalorder %s17_s24, 4  }
 0x1a3   :  { %16 = sbr.rel (!%p14_p4) target bundleno = 1 (0x1), region = 85 }

// kernel: _lambda_.3
= control target key start
LH: loop header
LB: loop body
LE: loop exit
PB: predicated region body
PF: predicated region fallthrough
CT: control target
= control target key end

     0   :  { %s2471_s0 = inlined_call_operand.vmem [shape: f32[16,32], index: 0, kind: input, shape index: {}]   ;;  %s2472_s1 = inlined_call_operand.vmem [shape: f32[2,1,32], index: 1, kind: input, shape index: {}]   ;;  %s2473_s2 = inlined_call_operand.vmem [shape: f32[2,1,32], index: 2, kind: input, shape index: {}]   ;;  %s2474_s3 = inlined_call_operand.vmem [shape: bf16[2,32,96], index: 3, kind: input, shape index: {}]   ;;  %s2475_s4 = inlined_call_operand.vmem [shape: f32[2,1,96], index: 4, kind: input, shape index: {}]   ;;  %s2476_s5 = inlined_call_operand.vmem [shape: bf16[2,32,32], index: 5, kind: input, shape index: {}]   ;;  %s2477_s6 = inlined_call_operand.vmem [shape: f32[2,1,32], index: 6, kind: input, shape index: {}]   ;;  %s2478_s7 = inlined_call_operand.vmem [shape: f32[2,1,32], index: 7, kind: input, shape index: {}]   ;;  %s2479_s8 = inlined_call_operand.vmem [shape: f32[2,1,32], index: 8, kind: input, shape index: {}]   ;;  %s2480_s9 = inlined_call_operand.vmem [shape: bf16[2,32,128], index: 9, kind: input, shape index: {}]   ;;  %s2481_s10 = inlined_call_operand.vmem [shape: f32[2,1,128], index: 10, kind: input, shape index: {}]   ;;  %s2482_s11 = inlined_call_operand.vmem [shape: bf16[2,128,32], index: 11, kind: input, shape index: {}]   ;;  %s2483_s12 = inlined_call_operand.vmem [shape: f32[2,1,32], index: 12, kind: input, shape index: {}]   ;;  %s2484_s13 = inlined_call_operand.vmem [shape: f32[1,32], index: 13, kind: input, shape index: {}]   ;;  %s2485_s14 = inlined_call_operand.vmem [shape: f32[1,32], index: 14, kind: input, shape index: {}]   ;;  %s2486_s15 = inlined_call_operand.hbm [shape: f32[16,32], index: 15, kind: output, shape index: {}]  }
   0x1   :  { %2489 = sst [smem:[#allocation9_spill]] %s2474_s3 }
   0x2   :  { %2490 = sst [smem:[#allocation10_spill]] %s2476_s5 }
   0x3   :  { %2491 = sst [smem:[#allocation11_spill]] %s2484_s13 }
   0x4   :  { %2492 = sst [smem:[#allocation12_spill]] %s2485_s14 }
   0x5   :  { %2493 = sst [smem:[#allocation13_spill]] %s2486_s15 }
   0x6   :  { %20 = vsyncpa [#allocation5], 0  ;;  %s2148_s18 = smov 0  }
   0x7 LB: > { %2494 = sst [smem:[#allocation7_spill]] %s2048_s18  ;;  %s2154_s19 = sadd.s32 4294967295, %s2048_s18   ;;  %s2048_s18 = sphi %s2148_s18, %s26_s18  }
   0x8   : > { %p1801_p0 = scmp.ge.s32.totalorder %s2048_s18, 1  ;;  %p527_p1 = scmp.lt.s32.totalorder %s2048_s18, 3 }
   0xa   : > { %p528_p2 = pnand %p1801_p0, %p527_p1 }
   0xc   : > { %531 = sbr.rel (%p528_p2) target bundleno = 2334 (0x91e), region = 80 }
  0x11   : > { %p609_p3 = scmp.lt.s32.totalorder %s2154_s19, 1  ;;  %s2495_s3 = sld [smem:[#allocation9_spill]] }
  0x12   : > { %s2496_s5 = sld [smem:[#allocation10_spill]]  ;;  %p1810_p4 = scmp.ne.s32.totalorder %s2154_s19, 0 }
  0x13   : > { %s2160_s20 = scalar_select %p609_p3, %s2154_s19, 1 }
  0x15   : > { %s1895_s27 = sshll.u32 %s2160_s20, 4  ;;  %s633_s13 = scalar_lea.vmem %s2478_s7, %s2160_s20 }
  0x16   : > { %s636_s30 = scalar_lea.vmem %s2479_s8, %s2160_s20  ;;  %s652_s28 = scalar_lea.vmem %s2483_s12, %s2160_s20 }
  0x17   : > { %s2178_s21 = scalar_lea.vmem %s2495_s3, %s1895_s27  ;;  %s2200_s3 = scalar_lea.vmem %s2480_s9, %s1895_s27 }
  0x18   : > { %s2183_s15 = scalar_lea.vmem %s2496_s5, %s1895_s27  ;;  %s644_s5 = scalar_lea.vmem %s2481_s10, %s2160_s20 }
  0x19   : > { %2497 = sst [smem:[#allocation8_spill]] %s2183_s15  ;;  %s1898_s15 = sshll.u32 %s2160_s20, 6 }
  0x1a   : > { %s2210_s24 = scalar_lea.vmem %s2482_s11, %s1898_s15  ;;  %657 = sbr.rel (%p1810_p4) target bundleno = 34 (0x22), region = 84 }
  0x1f   : > { %v658_v0 = vld [vmem:[%s2471_s0] sm:$0xff]  ;;  %vm660_vm0 = vcmask 261120   ;;  %v659_v1 = vld [vmem:[%s2471_s0 + $0x8] sm:$0xff] }
  0x20   : > { %661 = vst.msk [vmem:[#allocation2] sm:$0xff] %vm660_vm0, %v658_v0 }
  0x21   : > { %662 = vst.msk [vmem:[#allocation2 + $0x8] sm:$0xff] %vm660_vm0, %v659_v1 }
  0x22 PF: > { %vm667_vm1 = vcmask 261120   ;;  %v2050_v6 = vmov 32.0   ;;  %v1900_v23 = vld [vmem:[%s2178_s21 + $0x8] sm:$0xff]  ;;  %v1899_v25 = vld [vmem:[%s2178_s21] sm:$0xff]  ;;  %s2498_s18 = scalar_lea.vmem %s2472_s1, %s2160_s20  ;;  %s2499_s23 = scalar_lea.vmem %s2473_s2, %s2160_s20  ;;  %vm774_vm9 = vcmask 64512   ;;  %vm847_vm10 = vcmask 1043456  }
  0x23   : > { %1954 = vrcp.f32 %v2050_v6  ;;  %759 = vmatpush.bf16.msra.mxu0 %v1900_v23  ;;  %v1946_v44 = vld [vmem:[%s2498_s18] ss:$0 sm:$0xff]  ;;  %s2500_s29 = scalar_lea.vmem %s2475_s4, %s2160_s20  ;;  %s2051_s27 = smov 120   ;;  %vm887_vm11 = vcmask 60416   ;;  %vm1012_vm12 = vcmask 126016   ;;  %vm1137_vm13 = vcmask 191616  }
  0x24   : > { %v1947_v49 = vld [vmem:[%s2499_s23] ss:$0 sm:$0xff]  ;;  %s2052_s16 = smov 88   ;;  %s2053_s17 = smov 96   ;;  %vm1262_vm14 = vcmask 257216  }
  0x25   : > { %v1948_v54 = vld [vmem:[%s2500_s29] ss:$0 sm:$0xff]  ;;  %s2054_s15 = smov 112   ;;  %s2055_s21 = smov 80  }
  0x26   : > { %s2056_s18 = smov 104   ;;  %s2057_s22 = smov 72  }
  0x27   : > { %v2223_v2 = vld [vmem:[#allocation2] sm:$0xff]  ;;  %760 = vmatpush.bf16.msra.mxu0 %v1899_v25  ;;  %s2058_s14 = smov 64   ;;  %s2059_s23 = smov 48  }
  0x28   : > { %v668_v3 = vsel %vm667_vm1, %v2223_v2, 0.0  ;;  %v2227_v4 = vld [vmem:[#allocation2 + $0x8] sm:$0xff]  ;;  %s2060_s26 = smov 56   ;;  %s2061_s25 = smov 40  }
  0x29   : > { %669 = vadd.xlane.f32.xlu0 %v668_v3  ;;  %v671_v5 = vsel %vm667_vm1, %v2227_v4, 0.0  ;;  %v1955_v7 = vpop.eup %1954  ;;  %s2062_s29 = smov 16   ;;  %p1890_p5 = scmp.ne.s32.totalorder %s2154_s19, 1 }
  0x2a   : > { %v675_v8 = vmul.f32 32.0, %v1955_v7  ;;  %vm679_vm2 = vweird.f32 %v1955_v7 }
  0x2c   : > { %v676_v9 = vsub.f32 1.0, %v675_v8 }
  0x2e   : > { %v677_v10 = vmul.f32 %v1955_v7, %v676_v9 }
  0x30   : > { %v678_v11 = vadd.f32 %v1955_v7, %v677_v10 }
  0x31   : > { %672 = vadd.xlane.f32.xlu0 %v671_v5 }
  0x32   : > { %v2231_v12 = vsel %vm679_vm2, %v1955_v7, %v678_v11 }
  0x9c   : > { %v670_v13 = vpop.xlane.xlu0 %669 }
  0x9d   : > { %v681_v14 = vmul.f32 %v2231_v12, %v670_v13 }
  0x9f   : > { %v683_v15 = vsub.f32 %v2223_v2, %v681_v14 }
  0xa1   : > { %v685_v16 = vmul.f32 %v683_v15, %v683_v15 }
  0xa3   : > { %v687_v17 = vsel %vm667_vm1, %v685_v16, 0.0 }
  0xa4   : > { %688 = vadd.xlane.f32.xlu1 %v687_v17  ;;  %v673_v18 = vpop.xlane.xlu0 %672 }
  0xa5   : > { %v682_v19 = vmul.f32 %v2231_v12, %v673_v18 }
  0xa7   : > { %v684_v20 = vsub.f32 %v2227_v4, %v682_v19 }
  0xa9   : > { %v686_v21 = vmul.f32 %v684_v20, %v684_v20 }
  0xab   : > { %v690_v22 = vsel %vm667_vm1, %v686_v21, 0.0 }
  0xac   : > { %691 = vadd.xlane.f32.xlu1 %v690_v22 }
 0x117   : > { %v689_v24 = vpop.xlane.xlu1 %688 }
 0x118   : > { %v693_v26 = vmul.f32 %v689_v24, %v2231_v12 }
 0x11a   : > { %v695_v27 = vadd.f32 1e-05, %v693_v26 }
 0x11c   : > { %1956 = vrsqrt.f32 %v695_v27  ;;  %vm703_vm4 = vweird.f32 %v695_v27 }
 0x11f   : > { %v692_v28 = vpop.xlane.xlu1 %691 }
 0x120   : > { %v694_v29 = vmul.f32 %v692_v28, %v2231_v12 }
 0x122   : > { %v1957_v30 = vpop.eup %1956  ;;  %v696_v31 = vadd.f32 1e-05, %v694_v29 }
 0x123   : > { %v698_v32 = vmul.f32 %v1957_v30, %v695_v27  ;;  %vm704_vm3 = vweird.f32 %v1957_v30 }
 0x124   : > { %1958 = vrsqrt.f32 %v696_v31  ;;  %vm705_vm5 = vmor %vm703_vm4, %vm704_vm3  ;;  %vm713_vm7 = vweird.f32 %v696_v31 }
 0x125   : > { %v699_v33 = vmul.f32 %v1957_v30, %v698_v32 }
 0x127   : > { %v700_v34 = vmul.f32 0.5, %v699_v33 }
 0x129   : > { %v701_v35 = vsub.f32 1.5, %v700_v34 }
 0x12a   : > { %v1959_v36 = vpop.eup %1958 }
 0x12b   : > { %v702_v37 = vmul.f32 %v1957_v30, %v701_v35  ;;  %v708_v38 = vmul.f32 %v1959_v36, %v696_v31  ;;  %vm714_vm6 = vweird.f32 %v1959_v36 }
 0x12c   : > { %vm715_vm8 = vmor %vm713_vm7, %vm714_vm6 }
 0x12d   : > { %v709_v39 = vmul.f32 %v1959_v36, %v708_v38  ;;  %v706_v40 = vsel %vm705_vm5, %v1957_v30, %v702_v37 }
 0x12e   : > { %v717_v43 = vmul.f32 %v706_v40, %v683_v15 }
 0x12f   : > { %v710_v41 = vmul.f32 0.5, %v709_v39 }
 0x130   : > { %v722_v48 = vmul.f32 %v1946_v44, %v717_v43 }
 0x131   : > { %v711_v42 = vsub.f32 1.5, %v710_v41 }
 0x132   : > { %v727_v51 = vadd.f32 %v1947_v49, %v722_v48 }
 0x133   : > { %v712_v45 = vmul.f32 %v1959_v36, %v711_v42 }
 0x135   : > { %v716_v46 = vsel %vm715_vm8, %v1959_v36, %v712_v45 }
 0x136   : > { %v718_v47 = vmul.f32 %v716_v46, %v684_v20 }
 0x138   : > { %v723_v50 = vmul.f32 %v1946_v44, %v718_v47 }
 0x13a   : > { %v728_v52 = vadd.f32 %v1947_v49, %v723_v50 }
 0x13c   : > { %v729_v53 = vpack.c.bf16 %v728_v52, %v727_v51 }
 0x13e   : > { %1819 = vmatmul.msk.bf16.vlgmr.msra.gmra.mxu0 %vm667_vm1, %v729_v53 }
 0x1bb   : > { %v762_v55 = vpop.f32.mrf.mxu0 }
 0x1bc   : > { %v763_v56 = vadd.f32 %v1948_v54, %v762_v55 }
 0x1be   : > { %v767_v57 = vpack.c.bf16 %v763_v56, %v763_v56 }
 0x1c0   : > { %v770_v58 = vunpack.c.l.b16 %v767_v57 }
 0x1c2   : > { %v2259_v59 = vpack.c.b16 %v770_v58, %v770_v58 }
 0x1c3   : > { %v764_v60 = vpop.f32.mrf.mxu0 }
 0x1c4   : > { %v765_v61 = vadd.f32 %v1948_v54, %v764_v60  ;;  %890 = vrot.lane.b32.xlu1 %v2259_v59, %s2051_s27  ;;  %892 = vrot.lane.b32.xlu0 %v2259_v59, %s2052_s16 }
 0x1c5   : > { %772 = vrot.lane.b32.xlu2 %v2259_v59, %s2053_s17 }
 0x1c6   : > { %v768_v62 = vpack.c.bf16 %v765_v61, %v765_v61 }
 0x1c8   : > { %v795_v63 = vunpack.c.l.b16 %v768_v62 }
 0x1ca   : > { %v2264_v0 = vpack.c.b16 %v795_v63, %v795_v63 }
 0x1cc   : > { %1038 = vrot.lane.b32.xlu1 %v2264_v0, %s2054_s15  ;;  %1040 = vrot.lane.b32.xlu0 %v2264_v0, %s2055_s21 }
 0x1cd   : > { %797 = vrot.lane.b32.xlu2 %v2264_v0, %s2053_s17  ;;  %s2501_s17 = sld [smem:[#allocation8_spill]] }
 0x1d4   : > { %1140 = vrot.lane.b32.xlu1 %v2259_v59, %s2056_s18  ;;  %1142 = vrot.lane.b32.xlu0 %v2259_v59, %s2057_s22 }
 0x1d5   : > { %915 = vrot.lane.b32.xlu2 %v2264_v0, %s2052_s16  ;;  %s2064_s16 = smov 24  }
 0x1dc   : > { %1163 = vrot.lane.b32.xlu0 %v2264_v0, %s2056_s18  ;;  %s2502_s18 = scalar_lea.vmem %s2477_s6, %s2160_s20 }
 0x1dd   : > { %913 = vrot.lane.b32.xlu2 %v2264_v0, %s2051_s27  ;;  %s2063_s27 = smov 8  }
 0x1e4   : > { %842 = vrot.lane.b32.xlu0 %v2259_v59, %s2058_s14 }
 0x1e5   : > { %1017 = vrot.lane.b32.xlu2 %v2259_v59, %s2055_s21 }
 0x1ed   : > { %1015 = vrot.lane.b32.xlu2 %v2259_v59, %s2054_s15 }
 0x1f5   : > { %1165 = vrot.lane.b32.xlu2 %v2264_v0, %s2057_s22 }
 0x21f   : > { %v773_v1 = vpop.permute.xlu2 %772 }
 0x220   : > { %v779_v3 = vsel %vm774_vm9, %v773_v1, 0 }
 0x221   : > { %788 = vmatpush.bf16.xpose.msra.mxu1 %v779_v3 }
 0x227   : > { %v798_v5 = vpop.permute.xlu2 %797 }
 0x228   : > { %1820 = vmatmul.msk.bf16.vlgmr.msra.gmra.mxu1 %vm774_vm9, %v767_v57  ;;  %v803_v6 = vsel %vm774_vm9, %v798_v5, 0 }
 0x229   : > { %812 = vmatpush.bf16.xpose.msra.mxu2 %v803_v6 }
 0x22f   : > { %v916_v7 = vpop.permute.xlu2 %915 }
 0x230   : > { %1821 = vmatmul.msk.bf16.vlgmr.msra.gmra.mxu2 %vm774_vm9, %v768_v62  ;;  %v921_v8 = vsel %vm774_vm9, %v916_v7, 0 }
 0x231   : > { %930 = vmatpush.bf16.xpose.msrb.mxu1 %v921_v8 }
 0x236   : > { %v893_v9 = vpop.permute.xlu0 %892  ;;  %v891_v13 = vpop.permute.xlu1 %890 }
 0x237   : > { %v914_v10 = vpop.permute.xlu2 %913  ;;  %v898_v11 = vsel %vm774_vm9, %v893_v9, 0 }
 0x238   : > { %1825 = vmatmul.msk.bf16.vlgmr.msrb.gmra.mxu1 %vm774_vm9, %v914_v10  ;;  %907 = vmatpush.bf16.xpose.msrb.mxu0 %v898_v11 }
 0x23e   : > { %v1041_v14 = vpop.permute.xlu0 %1040  ;;  %v1039_v19 = vpop.permute.xlu1 %1038 }
 0x23f   : > { %v1046_v15 = vsel %vm774_vm9, %v1041_v14, 0  ;;  %v1018_v16 = vpop.permute.xlu2 %1017  ;;  %1824 = vmatmul.msk.bf16.vlgmr.msrb.gmra.mxu0 %vm774_vm9, %v891_v13 }
 0x240   : > { %v1023_v17 = vsel %vm774_vm9, %v1018_v16, 0  ;;  %1055 = vmatpush.bf16.xpose.msra.mxu1 %v1046_v15 }
 0x241   : > { %1032 = vmatpush.bf16.xpose.msra.mxu0 %v1023_v17 }
 0x246   : > { %v1143_v18 = vpop.permute.xlu0 %1142  ;;  %v1141_v27 = vpop.permute.xlu1 %1140 }
 0x247   : > { %v1148_v20 = vsel %vm774_vm9, %v1143_v18, 0  ;;  %v1016_v21 = vpop.permute.xlu2 %1015 }
 0x248   : > { %1829 = vmatmul.msk.bf16.vlgmr.msra.gmra.mxu1 %vm774_vm9, %v1039_v19 }
 0x249   : > { %1157 = vmatpush.bf16.xpose.msrb.mxu0 %v1148_v20 }
 0x24e   : > { %v1164_v22 = vpop.permute.xlu0 %1163 }
 0x24f   : > { %v1166_v23 = vpop.permute.xlu2 %1165  ;;  %1828 = vmatmul.msk.bf16.vlgmr.msra.gmra.mxu0 %vm774_vm9, %v1016_v21 }
 0x250   : > { %v1171_v24 = vsel %vm774_vm9, %v1166_v23, 0 }
 0x251   : > { %1180 = vmatpush.bf16.xpose.msrb.mxu1 %v1171_v24 }
 0x256   : > { %v843_v25 = vpop.permute.xlu0 %842 }
 0x257   : > { %v849_v26 = vsel %vm847_vm10, %v843_v25, 0 }
 0x258   : > { %1833 = vmatmul.msk.bf16.vlgmr.msrb.gmra.mxu1 %vm774_vm9, %v1164_v22  ;;  %858 = vmatpush.bf16.msra.mxu3 %v849_v26 }
 0x25f   : > { %1832 = vmatmul.msk.bf16.vlgmr.msrb.gmra.mxu0 %vm774_vm9, %v1141_v27 }
 0x2a5   : > { %v790_v28 = vpop.f32.mrf.mxu1 }
 0x2a6   : > { %v818_v29 = vsel %vm774_vm9, %v790_v28, -inf }
 0x2a7   : > { %819 = vmax.xlane.f32.xlu2 %v818_v29 }
 0x2ad   : > { %v792_v30 = vpop.f32.mrf.mxu1 }
 0x2b3   : > { %v814_v31 = vpop.f32.mrf.mxu2 }
 0x2b4   : > { %v821_v32 = vsel %vm774_vm9, %v814_v31, -inf }
 0x2b5   : > { %822 = vmax.xlane.f32.xlu1 %v821_v32  ;;  %v2298_v33 = vpop.f32.mrf.mxu1 }
 0x2b6   : > { %v939_v34 = vsel %vm774_vm9, %v2298_v33, -inf }
 0x2b7   : > { %940 = vmax.xlane.f32.xlu2 %v939_v34 }
 0x2bb   : > { %v816_v35 = vpop.f32.mrf.mxu2 }
 0x2bc   : > { %v909_v36 = vpop.f32.mrf.mxu0 }
 0x2bd   : > { %v934_v37 = vpop.f32.mrf.mxu1  ;;  %v936_v38 = vsel %vm774_vm9, %v909_v36, -inf }
 0x2be   : > { %937 = vmax.xlane.f32.xlu0 %v936_v38 }
 0x2c4   : > { %v911_v39 = vpop.f32.mrf.mxu0 }
 0x2c5   : > { %v2303_v40 = vpop.f32.mrf.mxu1 }
 0x2c6   : > { %v1064_v41 = vsel %vm774_vm9, %v2303_v40, -inf }
 0x2c7   : > { %1065 = vmax.xlane.f32.xlu1 %v1064_v41 }
 0x2cc   : > { %v1034_v42 = vpop.f32.mrf.mxu0 }
 0x2cd   : > { %v1059_v43 = vpop.f32.mrf.mxu1  ;;  %v1061_v44 = vsel %vm774_vm9, %v1034_v42, -inf }
 0x2ce   : > { %1062 = vmax.xlane.f32.xlu2 %v1061_v44 }
 0x2d4   : > { %v1036_v45 = vpop.f32.mrf.mxu0 }
 0x2d5   : > { %v2308_v46 = vpop.f32.mrf.mxu1 }
 0x2d6   : > { %v1189_v47 = vsel %vm774_vm9, %v2308_v46, -inf }
 0x2d7   : > { %1190 = vmax.xlane.f32.xlu0 %v1189_v47 }
 0x2dc   : > { %v1159_v48 = vpop.f32.mrf.mxu0 }
 0x2dd   : > { %v1184_v49 = vpop.f32.mrf.mxu1  ;;  %v1186_v50 = vsel %vm774_vm9, %v1159_v48, -inf }
 0x2de   : > { %1187 = vmax.xlane.f32.xlu2 %v1186_v50 }
 0x2e4   : > { %v1161_v51 = vpop.f32.mrf.mxu0 }
 0x2eb   : > { %1085 = vrot.lane.b32.xlu0 %v2259_v59, %s2059_s23 }
 0x2f6   : > { %960 = vrot.lane.b32.xlu2 %v2259_v59, %s2060_s26 }
 0x31a   : > { %v820_v52 = vpop.xlane.xlu2 %819 }
 0x31b   : > { %v824_v53 = vsub.f32 %v790_v28, %v820_v52 }
 0x31d   : > { %v826_v54 = vmul.f32 1.442695, %v824_v53 }
 0x31f   : > { %1960 = vpow2.f32 %v826_v54 }
 0x325   : > { %v1961_v55 = vpop.eup %1960 }
 0x326   : > { %v830_v56 = vsel %vm774_vm9, %v1961_v55, 0.0 }
 0x327   : > { %831 = vadd.xlane.f32.xlu1 %v830_v56 }
 0x328   : > { %v823_v57 = vpop.xlane.xlu1 %822 }
 0x329   : > { %v825_v61 = vsub.f32 %v814_v31, %v823_v57 }
 0x32a   : > { %v941_v1 = vpop.xlane.xlu2 %940 }
 0x32b   : > { %v828_v63 = vmul.f32 1.442695, %v825_v61  ;;  %v943_v18 = vsub.f32 %v2298_v33, %v941_v1 }
 0x32d   : > { %v946_v20 = vmul.f32 1.442695, %v943_v18 }
 0x331   : > { %v938_v58 = vpop.xlane.xlu0 %937 }
 0x332   : > { %v942_v60 = vsub.f32 %v909_v36, %v938_v58 }
 0x334   : > { %v944_v62 = vmul.f32 1.442695, %v942_v60 }
 0x336   : > { %1962 = vpow2.f32 %v944_v62 }
 0x337   : > { %1964 = vpow2.f32 %v828_v63 }
 0x33a   : > { %v1066_v26 = vpop.xlane.xlu1 %1065 }
 0x33b   : > { %v1068_v27 = vsub.f32 %v2303_v40, %v1066_v26 }
 0x33c   : > { %v2318_v3 = vpop.eup %1962 }
 0x33d   : > { %v948_v5 = vsel %vm774_vm9, %v2318_v3, 0.0  ;;  %v1965_v7 = vpop.eup %1964  ;;  %v1071_v28 = vmul.f32 1.442695, %v1068_v27 }
 0x33e   : > { %949 = vadd.xlane.f32.xlu2 %v948_v5  ;;  %v833_v10 = vsel %vm774_vm9, %v1965_v7, 0.0 }
 0x340   : > { %864 = vrot.lane.b32.xlu1 %v2264_v0, %s2058_s14 }
 0x341   : > { %v1063_v6 = vpop.xlane.xlu2 %1062 }
 0x342   : > { %v1067_v8 = vsub.f32 %v1034_v42, %v1063_v6 }
 0x344   : > { %v1069_v9 = vmul.f32 1.442695, %v1067_v8 }
 0x346   : > { %1966 = vpow2.f32 %v1069_v9  ;;  %834 = vadd.xlane.f32.xlu2 %v833_v10 }
 0x34a   : > { %v1191_v17 = vpop.xlane.xlu0 %1190 }
 0x34b   : > { %v1193_v32 = vsub.f32 %v2308_v46, %v1191_v17 }
 0x34c   : > { %v2325_v11 = vpop.eup %1966 }
 0x34d   : > { %v1073_v13 = vsel %vm774_vm9, %v2325_v11, 0.0  ;;  %v1196_v33 = vmul.f32 1.442695, %v1193_v32 }
 0x34e   : > { %1074 = vadd.xlane.f32.xlu0 %v1073_v13 }
 0x351   : > { %v1188_v14 = vpop.xlane.xlu2 %1187 }
 0x352   : > { %v1192_v15 = vsub.f32 %v1159_v48, %v1188_v14 }
 0x354   : > { %v1194_v16 = vmul.f32 1.442695, %v1192_v15 }
 0x356   : > { %1968 = vpow2.f32 %v1194_v16 }
 0x357   : > { %1970 = vpow2.f32 %v946_v20 }
 0x358   : > { %1972 = vpow2.f32 %v1071_v28 }
 0x359   : > { %v961_v38 = vpop.permute.xlu2 %960 }
 0x35a   : > { %v966_v42 = vsel %vm847_vm10, %v961_v38, 0 }
 0x35c   : > { %v2330_v19 = vpop.eup %1968 }
 0x35d   : > { %v1086_v21 = vpop.permute.xlu0 %1085  ;;  %v1198_v22 = vsel %vm774_vm9, %v2330_v19, 0.0  ;;  %v1971_v24 = vpop.eup %1970 }
 0x35e   : > { %981 = vrot.lane.b32.xlu2 %v2264_v0, %s2060_s26  ;;  %v1091_v23 = vsel %vm847_vm10, %v1086_v21, 0  ;;  %1199 = vadd.xlane.f32.xlu0 %v1198_v22  ;;  %v951_v25 = vsel %vm774_vm9, %v1971_v24, 0.0  ;;  %v2340_v29 = vpop.eup %1972 }
 0x35f   : > { %1100 = vmatpush.bf16.msrb.mxu2 %v1091_v23  ;;  %v1076_v30 = vsel %vm774_vm9, %v2340_v29, 0.0 }
 0x36a   : > { %952 = vadd.xlane.f32.xlu1 %v951_v25 }
 0x372   : > { %1231 = vrot.lane.b32.xlu0 %v2264_v0, %s2061_s25 }
 0x383   : > { %1106 = vrot.lane.b32.xlu1 %v2264_v0, %s2059_s23 }
 0x387   : > { %1077 = vadd.xlane.f32.xlu2 %v1076_v30 }
 0x39a   : > { %v832_v31 = vpop.xlane.xlu1 %831 }
 0x39b   : > { %1974 = vrcp.f32 %v832_v31 }
 0x39c   : > { %1976 = vpow2.f32 %v1196_v33 }
 0x39f   : > { %1210 = vrot.lane.b32.xlu2 %v2259_v59, %s2061_s25 }
 0x3a1   : > { %v1975_v34 = vpop.eup %1974 }
 0x3a2   : > { %v838_v35 = vmul.f32 %v1975_v34, %v1961_v55  ;;  %v1977_v37 = vpop.eup %1976 }
 0x3a3   : > { %v1201_v0 = vsel %vm774_vm9, %v1977_v37, 0.0 }
 0x3a4   : > { %v840_v36 = vpack.c.bf16 %v838_v35, %v838_v35 }
 0x3a6   : > { %1822 = vmatmul.msk.bf16.vlgmr.msra.gmra.mxu3 %vm774_vm9, %v840_v36 }
 0x3ad   : > { %1202 = vadd.xlane.f32.xlu1 %v1201_v0 }
 0x3b1   : > { %v950_v39 = vpop.xlane.xlu2 %949 }
 0x3b2   : > { %v865_v40 = vpop.permute.xlu1 %864 }
 0x3b3   : > { %v870_v41 = vsel %vm847_vm10, %v865_v40, 0 }
 0x3b4   : > { %879 = vmatpush.bf16.msrb.mxu3 %v870_v41 }
 0x3b8   : > { %975 = vmatpush.bf16.msra.mxu3 %v966_v42 }
 0x3b9   : > { %v835_v59 = vpop.xlane.xlu2 %834 }
 0x3ba   : > { %1978 = vrcp.f32 %v835_v59 }
 0x3c0   : > { %v1979_v43 = vpop.eup %1978 }
 0x3c1   : > { %v839_v44 = vmul.f32 %v1979_v43, %v1965_v7  ;;  %v1075_v45 = vpop.xlane.xlu0 %1074  ;;  %v982_v46 = vpop.permute.xlu2 %981  ;;  %v1903_v43 = vld [vmem:[%s2501_s17 + $0x8] sm:$0xff] }
 0x3c2   : > { %1980 = vrcp.f32 %v1075_v45  ;;  %v987_v48 = vsel %vm847_vm10, %v982_v46, 0  ;;  %1297 = vmatpush.bf16.msra.mxu0 %v1903_v43  ;;  %v1902_v45 = vld [vmem:[%s2501_s17] sm:$0xff]  ;;  %v1912_v43 = vld [vmem:[%s2210_s24 + $0x30] sm:$0xff] }
 0x3c3   : > { %v841_v47 = vpack.c.bf16 %v839_v44, %v839_v44  ;;  %1982 = vrcp.f32 %v950_v39 }
 0x3c5   : > { %1823 = vmatmul.msk.bf16.vlgmr.msrb.gmra.mxu3 %vm774_vm9, %v841_v47 }
 0x3c6   : > { %996 = vmatpush.bf16.msrb.mxu3 %v987_v48  ;;  %1298 = vmatpush.bf16.msra.mxu0 %v1902_v45 }
 0x3c8   : > { %v1981_v49 = vpop.eup %1980 }
 0x3c9   : > { %v1081_v50 = vmul.f32 %v1981_v49, %v2325_v11  ;;  %v1983_v52 = vpop.eup %1982  ;;  %v1949_v49 = vld [vmem:[%s2502_s18] ss:$0 sm:$0xff] }
 0x3ca   : > { %v956_v53 = vmul.f32 %v1983_v52, %v2318_v3 }
 0x3cb   : > { %v1083_v51 = vpack.c.bf16 %v1081_v50, %v1081_v50 }
 0x3cc   : > { %v958_v54 = vpack.c.bf16 %v956_v53, %v956_v53 }
 0x3cd   : > { %1830 = vmatmul.msk.bf16.vlgmr.msrb.gmra.mxu2 %vm774_vm9, %v1083_v51 }
 0x3d1   : > { %v1200_v60 = vpop.xlane.xlu0 %1199 }
 0x3d5   : > { %1826 = vmatmul.msk.bf16.vlgmr.msra.gmra.mxu3 %vm774_vm9, %v958_v54 }
 0x3dd   : > { %v953_v55 = vpop.xlane.xlu1 %952 }
 0x3de   : > { %1984 = vrcp.f32 %v953_v55 }
 0x3df   : > { %1986 = vrcp.f32 %v1200_v60 }
 0x3e4   : > { %v1985_v56 = vpop.eup %1984  ;;  %v1232_v61 = vpop.permute.xlu0 %1231 }
 0x3e5   : > { %v957_v57 = vmul.f32 %v1985_v56, %v1971_v24  ;;  %v1237_v1 = vsel %vm847_vm10, %v1232_v61, 0  ;;  %v1987_v5 = vpop.eup %1986 }
 0x3e6   : > { %v1206_v7 = vmul.f32 %v1987_v5, %v2330_v19 }
 0x3e7   : > { %v959_v58 = vpack.c.bf16 %v957_v57, %v957_v57 }
 0x3e8   : > { %v1208_v13 = vpack.c.bf16 %v1206_v7, %v1206_v7 }
 0x3e9   : > { %1827 = vmatmul.msk.bf16.vlgmr.msrb.gmra.mxu3 %vm774_vm9, %v959_v58 }
 0x3f5   : > { %v1107_v62 = vpop.permute.xlu1 %1106 }
 0x3f6   : > { %v1112_v63 = vsel %vm847_vm10, %v1107_v62, 0 }
 0x3f7   : > { %1121 = vmatpush.bf16.msra.mxu3 %v1112_v63 }
 0x3fa   : > { %v1078_v3 = vpop.xlane.xlu2 %1077 }
 0x3fb   : > { %1246 = vmatpush.bf16.msrb.mxu3 %v1237_v1  ;;  %1988 = vrcp.f32 %v1078_v3 }
 0x401   : > { %v1989_v6 = vpop.eup %1988 }
 0x402   : > { %v1082_v8 = vmul.f32 %v1989_v6, %v2340_v29  ;;  %v1211_v9 = vpop.permute.xlu2 %1210  ;;  %v1905_v6 = vld [vmem:[%s2200_s3 + $0x8] sm:$0xff] }
 0x403   : > { %v1216_v10 = vsel %vm847_vm10, %v1211_v9, 0  ;;  %1399 = vmatpush.bf16.msra.mxu1 %v1905_v6  ;;  %v1904_v9 = vld [vmem:[%s2200_s3] sm:$0xff] }
 0x404   : > { %v1084_v11 = vpack.c.bf16 %v1082_v8, %v1082_v8  ;;  %1225 = vmatpush.bf16.msra.mxu2 %v1216_v10 }
 0x406   : > { %1831 = vmatmul.msk.bf16.vlgmr.msra.gmra.mxu3 %vm774_vm9, %v1084_v11 }
 0x407   : > { %1834 = vmatmul.msk.bf16.vlgmr.msra.gmra.mxu2 %vm774_vm9, %v1208_v13  ;;  %1400 = vmatpush.bf16.msra.mxu1 %v1904_v9 }
 0x420   : > { %v1203_v14 = vpop.xlane.xlu1 %1202 }
 0x421   : > { %1990 = vrcp.f32 %v1203_v14 }
 0x427   : > { %v1991_v15 = vpop.eup %1990 }
 0x428   : > { %v1207_v16 = vmul.f32 %v1991_v15, %v1977_v37 }
 0x429   : > { %v860_v17 = vpop.f32.mrf.mxu3 }
 0x42a   : > { %v1209_v18 = vpack.c.bf16 %v1207_v16, %v1207_v16  ;;  %v885_v19 = vpack.c.bf16 %v860_v17, %v860_v17 }
 0x42c   : > { %888 = vst.msk [vmem:[#allocation3] sm:$0xf] %vm887_vm11, %v885_v19  ;;  %1835 = vmatmul.msk.bf16.vlgmr.msrb.gmra.mxu3 %vm774_vm9, %v1209_v18 }
 0x431   : > { %v862_v20 = vpop.f32.mrf.mxu3 }
 0x448   : > { %v881_v21 = vpop.f32.mrf.mxu3 }
 0x449   : > { %v886_v22 = vpack.c.bf16 %v881_v21, %v881_v21 }
 0x44b   : > { %889 = vst.msk [vmem:[#allocation3 + $0x4] sm:$0xf] %vm887_vm11, %v886_v22 }
 0x450   : > { %v883_v23 = vpop.f32.mrf.mxu3  ;;  %v1102_v24 = vpop.f32.mrf.mxu2 }
 0x451   : > { %v1127_v25 = vpack.c.bf16 %v1102_v24, %v1102_v24 }
 0x453   : > { %1131 = vrot.lane.b32.xlu1 %v1127_v25, %s2062_s29 }
 0x458   : > { %v977_v26 = vpop.f32.mrf.mxu3  ;;  %v1104_v27 = vpop.f32.mrf.mxu2 }
 0x459   : > { %v1002_v28 = vpack.c.bf16 %v977_v26, %v977_v26  ;;  %v1950_v27 = vld [vmem:[%s633_s13] ss:$0 sm:$0xff] }
 0x45b   : > { %1006 = vrot.lane.b32.xlu2 %v1002_v28, %s2063_s27 }
 0x460   : > { %v979_v29 = vpop.f32.mrf.mxu3 }
 0x46c   : > { %v998_v30 = vpop.f32.mrf.mxu3 }
 0x46d   : > { %v1003_v31 = vpack.c.bf16 %v998_v30, %v998_v30 }
 0x46f   : > { %1008 = vrot.lane.b32.xlu2 %v1003_v31, %s2063_s27  ;;  %v1951_v31 = vld [vmem:[%s636_s30] ss:$0 sm:$0xff] }
 0x474   : > { %v1000_v32 = vpop.f32.mrf.mxu3 }
 0x489   : > { %v1123_v33 = vpop.f32.mrf.mxu3 }
 0x48a   : > { %v1128_v34 = vpack.c.bf16 %v1123_v33, %v1123_v33  ;;  %v1227_v35 = vpop.f32.mrf.mxu2 }
 0x48b   : > { %v1252_v36 = vpack.c.bf16 %v1227_v35, %v1227_v35 }
 0x48c   : > { %1133 = vrot.lane.b32.xlu2 %v1128_v34, %s2062_s29 }
 0x48d   : > { %1256 = vrot.lane.b32.xlu0 %v1252_v36, %s2064_s16 }
 0x491   : > { %v1125_v37 = vpop.f32.mrf.mxu3 }
 0x492   : > { %v1229_v38 = vpop.f32.mrf.mxu2 }
 0x493   : > { %v1952_v38 = vld [vmem:[%s644_s5] ss:$0 sm:$0xff] }
 0x4af   : > { %v1248_v0 = vpop.f32.mrf.mxu3 }
 0x4b0   : > { %v1253_v39 = vpack.c.bf16 %v1248_v0, %v1248_v0 }
 0x4b2   : > { %1258 = vrot.lane.b32.xlu2 %v1253_v39, %s2064_s16  ;;  %s2504_s16 = sld [smem:[#allocation12_spill]] (!%p1890_p5) }
 0x4b5   : > { %v1007_v40 = vpop.permute.xlu2 %1006 }
 0x4b6   : > { %1013 = vst.msk [vmem:[#allocation3] sm:$0xf] %vm1012_vm12, %v1007_v40 }
 0x4b7   : > { %v1250_v41 = vpop.f32.mrf.mxu3 }
 0x4b8   : > { %v1913_v41 = vld [vmem:[%s2210_s24 + $0x38] sm:$0xff] }
 0x4b9   : > { %1552 = vmatpush.bf16.msrb.mxu2 %v1913_v41 }
 0x4bd   : > { %1553 = vmatpush.bf16.msrb.mxu2 %v1912_v43 }
 0x4c5   : > { %v1132_v42 = vpop.permute.xlu1 %1131 }
 0x4c6   : > { %1138 = vst.msk [vmem:[#allocation3] sm:$0xf] %vm1137_vm13, %v1132_v42 }
 0x4c9   : > { %v1009_v59 = vpop.permute.xlu2 %1008 }
 0x4ca   : > { %1014 = vst.msk [vmem:[#allocation3 + $0x4] sm:$0xf] %vm1012_vm12, %v1009_v59 }
 0x4e6   : > { %v1134_v44 = vpop.permute.xlu2 %1133 }
 0x4e7   : > { %1139 = vst.msk [vmem:[#allocation3 + $0x4] sm:$0xf] %vm1137_vm13, %v1134_v44 }
 0x4ff   : > { %v1257_v46 = vpop.permute.xlu0 %1256 }
 0x500   : > { %1263 = vst.msk [vmem:[#allocation3] sm:$0xf] %vm1262_vm14, %v1257_v46 }
 0x50c   : > { %v1259_v47 = vpop.permute.xlu2 %1258 }
 0x50d   : > { %1264 = vst.msk [vmem:[#allocation3 + $0x4] sm:$0xf] %vm1262_vm14, %v1259_v47  ;;  %v1911_v47 = vld [vmem:[%s2210_s24 + $0x28] sm:$0xff] }
 0x50e   : > { %1554 = vmatpush.bf16.msrb.mxu2 %v1911_v47  ;;  %v2065_v47 = vmov -1.0  }
 0x514   : > { %v1901_v48 = vld [vmem:[#allocation3] sm:$0xff] }
 0x515   : > { %1848 = vmatmul.msk.bf16.vlgmr.msra.gmra.mxu0 %vm667_vm1, %v1901_v48 }
 0x592   : > { %v1300_v50 = vpop.f32.mrf.mxu0 }
 0x593   : > { %v1305_v51 = vadd.f32 %v1300_v50, %v2223_v2  ;;  %v1910_v50 = vld [vmem:[%s2210_s24 + $0x20] sm:$0xff] }
 0x594   : > { %1555 = vmatpush.bf16.msrb.mxu2 %v1910_v50 }
 0x595   : > { %v2378_v52 = vadd.f32 %v1949_v49, %v1305_v51 }
 0x597   : > { %v1315_v53 = vsel %vm667_vm1, %v2378_v52, 0.0 }
 0x598   : > { %1316 = vadd.xlane.f32.xlu0 %v1315_v53 }
 0x59a   : > { %v1302_v54 = vpop.f32.mrf.mxu0 }
 0x59b   : > { %v1306_v55 = vadd.f32 %v1302_v54, %v2227_v4 }
 0x59d   : > { %v2383_v56 = vadd.f32 %v1949_v49, %v1306_v55 }
 0x59f   : > { %v1318_v57 = vsel %vm667_vm1, %v2383_v56, 0.0 }
 0x5a0   : > { %1319 = vadd.xlane.f32.xlu2 %v1318_v57  ;;  %v1909_v57 = vld [vmem:[%s2210_s24 + $0x18] sm:$0xff] }
 0x5a1   : > { %1556 = vmatpush.bf16.msrb.mxu2 %v1909_v57 }
 0x60b   : > { %v1317_v58 = vpop.xlane.xlu0 %1316 }
 0x60c   : > { %v1321_v2 = vmul.f32 %v1317_v58, %v2231_v12 }
 0x60e   : > { %v1323_v60 = vsub.f32 %v2378_v52, %v1321_v2 }
 0x610   : > { %v1325_v61 = vmul.f32 %v1323_v60, %v1323_v60 }
 0x612   : > { %v1327_v62 = vsel %vm667_vm1, %v1325_v61, 0.0 }
 0x613   : > { %1328 = vadd.xlane.f32.xlu1 %v1327_v62  ;;  %v1320_v63 = vpop.xlane.xlu2 %1319  ;;  %v1908_v62 = vld [vmem:[%s2210_s24 + $0x10] sm:$0xff] }
 0x614   : > { %v1322_v4 = vmul.f32 %v1320_v63, %v2231_v12  ;;  %1557 = vmatpush.bf16.msrb.mxu2 %v1908_v62 }
 0x616   : > { %v1324_v1 = vsub.f32 %v2383_v56, %v1322_v4 }
 0x618   : > { %v1326_v3 = vmul.f32 %v1324_v1, %v1324_v1 }
 0x61a   : > { %v1330_v5 = vsel %vm667_vm1, %v1326_v3, 0.0 }
 0x61b   : > { %1331 = vadd.xlane.f32.xlu0 %v1330_v5 }
 0x686   : > { %v1329_v7 = vpop.xlane.xlu1 %1328 }
 0x687   : > { %v1333_v8 = vmul.f32 %v1329_v7, %v2231_v12  ;;  %v1907_v7 = vld [vmem:[%s2210_s24 + $0x8] sm:$0xff] }
 0x688   : > { %1558 = vmatpush.bf16.msrb.mxu2 %v1907_v7 }
 0x689   : > { %v1335_v10 = vadd.f32 1e-05, %v1333_v8 }
 0x68b   : > { %1992 = vrsqrt.f32 %v1335_v10  ;;  %vm1343_vm0 = vweird.f32 %v1335_v10 }
 0x68e   : > { %v1332_v11 = vpop.xlane.xlu0 %1331 }
 0x68f   : > { %v1334_v13 = vmul.f32 %v1332_v11, %v2231_v12 }
 0x691   : > { %v1993_v14 = vpop.eup %1992  ;;  %v1336_v15 = vadd.f32 1e-05, %v1334_v13 }
 0x692   : > { %v1338_v16 = vmul.f32 %v1993_v14, %v1335_v10  ;;  %vm1344_vm15 = vweird.f32 %v1993_v14 }
 0x693   : > { %1994 = vrsqrt.f32 %v1336_v15  ;;  %vm1345_vm2 = vmor %vm1343_vm0, %vm1344_vm15  ;;  %vm1353_vm4 = vweird.f32 %v1336_v15 }
 0x694   : > { %v1339_v17 = vmul.f32 %v1993_v14, %v1338_v16  ;;  %v1906_v16 = vld [vmem:[%s2210_s24] sm:$0xff] }
 0x695   : > { %1559 = vmatpush.bf16.msrb.mxu2 %v1906_v16 }
 0x696   : > { %v1340_v18 = vmul.f32 0.5, %v1339_v17 }
 0x698   : > { %v1341_v19 = vsub.f32 1.5, %v1340_v18 }
 0x699   : > { %v1995_v20 = vpop.eup %1994 }
 0x69a   : > { %v1342_v21 = vmul.f32 %v1993_v14, %v1341_v19  ;;  %v1348_v22 = vmul.f32 %v1995_v20, %v1336_v15  ;;  %vm1354_vm3 = vweird.f32 %v1995_v20 }
 0x69b   : > { %vm1355_vm5 = vmor %vm1353_vm4, %vm1354_vm3 }
 0x69c   : > { %v1349_v23 = vmul.f32 %v1995_v20, %v1348_v22  ;;  %v1346_v24 = vsel %vm1345_vm2, %v1993_v14, %v1342_v21 }
 0x69d   : > { %v1357_v28 = vmul.f32 %v1346_v24, %v1323_v60 }
 0x69e   : > { %v1350_v25 = vmul.f32 0.5, %v1349_v23 }
 0x69f   : > { %v1362_v32 = vmul.f32 %v1950_v27, %v1357_v28 }
 0x6a0   : > { %v1351_v26 = vsub.f32 1.5, %v1350_v25 }
 0x6a1   : > { %v1367_v35 = vadd.f32 %v1951_v31, %v1362_v32 }
 0x6a2   : > { %v1352_v29 = vmul.f32 %v1995_v20, %v1351_v26 }
 0x6a4   : > { %v1356_v30 = vsel %vm1355_vm5, %v1995_v20, %v1352_v29 }
 0x6a5   : > { %v1358_v33 = vmul.f32 %v1356_v30, %v1324_v1 }
 0x6a7   : > { %v1363_v34 = vmul.f32 %v1950_v27, %v1358_v33 }
 0x6a9   : > { %v1368_v36 = vadd.f32 %v1951_v31, %v1363_v34 }
 0x6ab   : > { %v1369_v37 = vpack.c.bf16 %v1368_v36, %v1367_v35 }
 0x6ad   : > { %1857 = vmatmul.msk.bf16.vlgmr.msra.gmra.mxu1 %vm667_vm1, %v1369_v37 }
 0x72a   : > { %v1402_v0 = vpop.f32.mrf.mxu1 }
 0x72b   : > { %v2413_v39 = vadd.f32 %v1952_v38, %v1402_v0 }
 0x72d   : > { %v2416_v40 = vmul.f32 0.70710677, %v2413_v39 }
 0x72f   : > { %v1415_v42 = vand.u32 2147483647, %v2416_v40  ;;  %vm1411_vm14 = vcmp.ge.f32.partialorder %v2416_v40, 0.0 }
 0x731   : > { %v1417_v59 = vmul.f32 0.3275911, %v1415_v42  ;;  %v1469_v9 = vsub.f32 0.0, %v1415_v42 }
 0x732   : > { %v1404_v44 = vpop.f32.mrf.mxu1 }
 0x733   : > { %v1419_v45 = vadd.f32 1.0, %v1417_v59  ;;  %v2421_v46 = vadd.f32 %v1952_v38, %v1404_v44  ;;  %v1471_v18 = vmul.f32 %v1469_v9, %v1415_v42 }
 0x735   : > { %1996 = vrcp.f32 %v1419_v45  ;;  %v2425_v48 = vmul.f32 0.70710677, %v2421_v46  ;;  %v1432_v2 = vand.u32 2147483648, %v1419_v45  ;;  %v1430_v61 = vand.u32 2147483647, %v1419_v45 }
 0x736   : > { %vm1426_vm7 = vweird.f32 %v1419_v45  ;;  %v1473_v24 = vmul.f32 1.442695, %v1471_v18 }
 0x737   : > { %v1416_v49 = vand.u32 2147483647, %v2425_v48  ;;  %v1433_v4 = vor.u32 1.1754944e-38, %v1432_v2  ;;  %vm1431_vm9 = vcmp.eq.f32.partialorder %v1430_v61, 8.507059e+37  ;;  %vm1412_vm15 = vcmp.ge.f32.partialorder %v2425_v48, 0.0 }
 0x738   : > { %v1408_v2 = vmul.f32 0.5, %v2421_v46 }
 0x739   : > { %v1418_v51 = vmul.f32 0.3275911, %v1416_v49  ;;  %v1470_v26 = vsub.f32 0.0, %v1416_v49 }
 0x73b   : > { %v1997_v53 = vpop.eup %1996  ;;  %v1420_v55 = vadd.f32 1.0, %v1418_v51  ;;  %v1472_v31 = vmul.f32 %v1470_v26, %v1416_v49  ;;  %v1413_v49 = vsel %vm1411_vm14, 1.0, %v2065_v47 }
 0x73c   : > { %v1422_v54 = vmul.f32 %v1997_v53, %v1419_v45  ;;  %vm1427_vm6 = vweird.f32 %v1997_v53 }
 0x73d   : > { %1998 = vrcp.f32 %v1420_v55  ;;  %vm1428_vm8 = vmor %vm1426_vm7, %vm1427_vm6  ;;  %v1447_v13 = vand.u32 2147483648, %v1420_v55  ;;  %v1445_v15 = vand.u32 2147483647, %v1420_v55  ;;  %vm1441_vm11 = vweird.f32 %v1420_v55 }
 0x73e   : > { %v1423_v58 = vsub.f32 1.0, %v1422_v54  ;;  %2000 = vpow2.f32 %v1473_v24  ;;  %v1475_v36 = vmul.f32 1.442695, %v1472_v31  ;;  %v1414_v54 = vsel %vm1412_vm15, 1.0, %v2065_v47 }
 0x73f   : > { %v1448_v21 = vor.u32 1.1754944e-38, %v1447_v13  ;;  %vm1446_vm13 = vcmp.eq.f32.partialorder %v1445_v15, 8.507059e+37 }
 0x740   : > { %v1424_v60 = vmul.f32 %v1997_v53, %v1423_v58  ;;  %2002 = vpow2.f32 %v1475_v36  ;;  %v1407_v58 = vmul.f32 0.5, %v2413_v39 }
 0x742   : > { %v1425_v63 = vadd.f32 %v1997_v53, %v1424_v60 }
 0x743   : > { %v1999_v1 = vpop.eup %1998 }
 0x744   : > { %v1429_v3 = vsel %vm1428_vm8, %v1997_v53, %v1425_v63  ;;  %v1437_v6 = vmul.f32 %v1999_v1, %v1420_v55  ;;  %vm1442_vm10 = vweird.f32 %v1999_v1  ;;  %v2001_v38 = vpop.eup %2000  ;;  %v1953_v63 = vld [vmem:[%s652_s28] ss:$0 sm:$0xff]  ;;  %s2503_s28 = sld [smem:[#allocation11_spill]] (!%p1890_p5) }
 0x745   : > { %v1434_v5 = vsel %vm1431_vm9, %v1433_v4, %v1429_v3  ;;  %vm1443_vm12 = vmor %vm1441_vm11, %vm1442_vm10 }
 0x746   : > { %v1451_v8 = vmul.f32 1.0614054, %v1434_v5  ;;  %v1438_v10 = vsub.f32 1.0, %v1437_v6  ;;  %v2003_v45 = vpop.eup %2002 }
 0x748   : > { %v1453_v11 = vadd.f32 -1.4531521, %v1451_v8  ;;  %v1439_v14 = vmul.f32 %v1999_v1, %v1438_v10 }
 0x74a   : > { %v1455_v17 = vmul.f32 %v1453_v11, %v1434_v5  ;;  %v1440_v19 = vadd.f32 %v1999_v1, %v1439_v14 }
 0x74c   : > { %v1457_v20 = vadd.f32 1.4214138, %v1455_v17  ;;  %v1444_v22 = vsel %vm1443_vm12, %v1999_v1, %v1440_v19 }
 0x74d   : > { %v1449_v25 = vsel %vm1446_vm13, %v1448_v21, %v1444_v22 }
 0x74e   : > { %v1459_v23 = vmul.f32 %v1457_v20, %v1434_v5  ;;  %v1452_v27 = vmul.f32 1.0614054, %v1449_v25 }
 0x750   : > { %v1461_v28 = vadd.f32 -0.28449672, %v1459_v23  ;;  %v1454_v29 = vadd.f32 -1.4531521, %v1452_v27 }
 0x752   : > { %v1463_v30 = vmul.f32 %v1461_v28, %v1434_v5  ;;  %v1456_v32 = vmul.f32 %v1454_v29, %v1449_v25 }
 0x754   : > { %v1465_v33 = vadd.f32 0.2548296, %v1463_v30  ;;  %v1458_v34 = vadd.f32 1.4214138, %v1456_v32 }
 0x756   : > { %v1467_v35 = vmul.f32 %v1465_v33, %v1434_v5  ;;  %v1460_v37 = vmul.f32 %v1458_v34, %v1449_v25 }
 0x758   : > { %v1477_v0 = vmul.f32 %v2001_v38, %v1467_v35  ;;  %v1462_v41 = vadd.f32 -0.28449672, %v1460_v37 }
 0x75a   : > { %v1464_v42 = vmul.f32 %v1462_v41, %v1449_v25  ;;  %v1479_v59 = vsub.f32 1.0, %v1477_v0 }
 0x75c   : > { %v1466_v43 = vadd.f32 0.2548296, %v1464_v42  ;;  %v1481_v50 = vmul.f32 %v1479_v59, %v1413_v49 }
 0x75e   : > { %v1468_v44 = vmul.f32 %v1466_v43, %v1449_v25  ;;  %v1483_v55 = vadd.f32 1.0, %v1481_v50 }
 0x760   : > { %v1478_v51 = vmul.f32 %v2003_v45, %v1468_v44  ;;  %v1485_v60 = vmul.f32 %v1483_v55, %v1407_v58 }
 0x762   : > { %v1480_v53 = vsub.f32 1.0, %v1478_v51 }
 0x764   : > { %v1482_v57 = vmul.f32 %v1480_v53, %v1414_v54 }
 0x766   : > { %v1484_v40 = vadd.f32 1.0, %v1482_v57 }
 0x768   : > { %v1486_v61 = vmul.f32 %v1484_v40, %v1408_v2 }
 0x76a   : > { %v1487_v62 = vpack.c.bf16 %v1486_v61, %v1485_v60 }
 0x76c   : > { %1560 = vmatmul.bf16.vlgmr.msrb.gmra.mxu2 %v1487_v62 }
 0x7ef   : > { %v1561_v48 = vpop.f32.mrf.mxu2 }
 0x7f0   : > { %v1566_v4 = vadd.f32 %v1561_v48, %v2378_v52 }
 0x7f2   : > { %v1572_v1 = vadd.f32 %v1953_v63, %v1566_v4 }
 0x7f4   : > { %1574 = vst.msk [vmem:[#allocation2] sm:$0xff] %vm667_vm1, %v1572_v1 }
 0x7f7   : > { %v1563_v3 = vpop.f32.mrf.mxu2 }
 0x7f8   : > { %v1567_v39 = vadd.f32 %v1563_v3, %v2383_v56  ;;  %1579 = sbr.rel (%p1890_p5) target bundleno = 2323 (0x913), region = 88 }
 0x7fa   : > { %v1573_v46 = vadd.f32 %v1953_v63, %v1567_v39 }
 0x7fc   : > { %1575 = vst.msk [vmem:[#allocation2 + $0x8] sm:$0xff] %vm667_vm1, %v1573_v46 }
 0x7fd   : > { %v1580_v5 = vld [vmem:[#allocation2] sm:$0xff] }
 0x7fe   : > { %v1584_v6 = vsel %vm667_vm1, %v1580_v5, 0.0  ;;  %v2004_v32 = vld [vmem:[%s2503_s28] ss:$0 sm:$0xff] }
 0x7ff   : > { %1585 = vadd.xlane.f32.xlu0 %v1584_v6 }
 0x803   : > { %v1581_v7 = vld [vmem:[#allocation2 + $0x8] sm:$0xff] }
 0x804   : > { %v1587_v8 = vsel %vm667_vm1, %v1581_v7, 0.0 }
 0x807   : > { %1588 = vadd.xlane.f32.xlu0 %v1587_v8 }
 0x872   : > { %v1586_v52 = vpop.xlane.xlu0 %1585 }
 0x873   : > { %v1590_v9 = vmul.f32 %v1586_v52, %v2231_v12 }
 0x875   : > { %v1592_v10 = vsub.f32 %v1580_v5, %v1590_v9 }
 0x877   : > { %v1594_v11 = vmul.f32 %v1592_v10, %v1592_v10 }
 0x879   : > { %v1596_v56 = vsel %vm667_vm1, %v1594_v11, 0.0 }
 0x87a   : > { %1597 = vadd.xlane.f32.xlu1 %v1596_v56  ;;  %v1589_v13 = vpop.xlane.xlu0 %1588 }
 0x87b   : > { %v1591_v14 = vmul.f32 %v1589_v13, %v2231_v12 }
 0x87d   : > { %v1593_v15 = vsub.f32 %v1581_v7, %v1591_v14 }
 0x87f   : > { %v1595_v16 = vmul.f32 %v1593_v15, %v1593_v15 }
 0x881   : > { %v1599_v17 = vsel %vm667_vm1, %v1595_v16, 0.0 }
 0x882   : > { %1600 = vadd.xlane.f32.xlu1 %v1599_v17 }
 0x8ed   : > { %v1598_v18 = vpop.xlane.xlu1 %1597 }
 0x8ee   : > { %v1602_v19 = vmul.f32 %v1598_v18, %v2231_v12 }
 0x8f0   : > { %v1604_v20 = vadd.f32 1e-05, %v1602_v19 }
 0x8f2   : > { %2006 = vrsqrt.f32 %v1604_v20  ;;  %vm1612_vm2 = vweird.f32 %v1604_v20 }
 0x8f5   : > { %v1601_v21 = vpop.xlane.xlu1 %1600 }
 0x8f6   : > { %v1603_v22 = vmul.f32 %v1601_v21, %v2231_v12  ;;  %v2005_v12 = vld [vmem:[%s2504_s16] ss:$0 sm:$0xff] }
 0x8f8   : > { %v2007_v23 = vpop.eup %2006  ;;  %v1605_v24 = vadd.f32 1e-05, %v1603_v22 }
 0x8f9   : > { %v1607_v25 = vmul.f32 %v2007_v23, %v1604_v20  ;;  %vm1613_vm0 = vweird.f32 %v2007_v23 }
 0x8fa   : > { %2008 = vrsqrt.f32 %v1605_v24  ;;  %vm1614_vm3 = vmor %vm1612_vm2, %vm1613_vm0  ;;  %vm1622_vm5 = vweird.f32 %v1605_v24 }
 0x8fb   : > { %v1608_v26 = vmul.f32 %v2007_v23, %v1607_v25 }
 0x8fd   : > { %v1609_v27 = vmul.f32 0.5, %v1608_v26 }
 0x8ff   : > { %v1610_v28 = vsub.f32 1.5, %v1609_v27 }
 0x900   : > { %v2009_v29 = vpop.eup %2008 }
 0x901   : > { %v1611_v30 = vmul.f32 %v2007_v23, %v1610_v28  ;;  %v1617_v31 = vmul.f32 %v2009_v29, %v1605_v24  ;;  %vm1623_vm4 = vweird.f32 %v2009_v29 }
 0x902   : > { %vm1624_vm6 = vmor %vm1622_vm5, %vm1623_vm4 }
 0x903   : > { %v1615_v33 = vsel %vm1614_vm3, %v2007_v23, %v1611_v30  ;;  %v1618_v34 = vmul.f32 %v2009_v29, %v1617_v31 }
 0x904   : > { %v1626_v35 = vmul.f32 %v1615_v33, %v1592_v10 }
 0x905   : > { %v1619_v36 = vmul.f32 0.5, %v1618_v34 }
 0x906   : > { %v1631_v37 = vmul.f32 %v2004_v32, %v1626_v35 }
 0x907   : > { %v1620_v38 = vsub.f32 1.5, %v1619_v36 }
 0x908   : > { %v1636_v0 = vadd.f32 %v2005_v12, %v1631_v37 }
 0x909   : > { %v1621_v41 = vmul.f32 %v2009_v29, %v1620_v38 }
 0x90a   : > { %1638 = vst.msk [vmem:[#allocation4] sm:$0xff] %vm667_vm1, %v1636_v0 }
 0x90b   : > { %v1625_v42 = vsel %vm1624_vm6, %v2009_v29, %v1621_v41 }
 0x90c   : > { %v1627_v59 = vmul.f32 %v1625_v42, %v1593_v15 }
 0x90e   : > { %v1632_v43 = vmul.f32 %v2004_v32, %v1627_v59 }
 0x910   : > { %v1637_v44 = vadd.f32 %v2005_v12, %v1632_v43 }
 0x912   : > { %1639 = vst.msk [vmem:[#allocation4 + $0x8] sm:$0xff] %vm667_vm1, %v1637_v44 }
 0x913 PF: > { %p1918_p6 = scmp.eq.s32.totalorder %s2154_s19, 1  ;;  %s2066_s17 = smov [#allocation4]  }
 0x914   : > { %s1645_s15 = sshll.u32 %s2066_s17, 4  ;;  %s2505_s3 = sld [smem:[#allocation13_spill]]  ;;  %s1646_s15 = int_to_ptr.vmem [resolvable:$true] %s1645_s15 }
 0x915   : > { %s2067_s14 = smov 128  }
 0x91a   : > { %s1647_s22 = sshll.u32 %s2505_s3, 4  ;;  %s1648_s22 = int_to_ptr.hbm [resolvable:$true] %s1647_s22 }
 0x91b   : > { %1915 = dma.vmem_to_hbm [thread:$0]  (%p1918_p6), %s1646_s15, 256, %s1648_s22, [#allocation5], %s2067_s14, %s2067_s14, %s2063_s27  }
 0x91c   : > { %2043 = dma.done.wait (%p1918_p6), [#allocation5], 256  }
 0x91d   : > { %2045 = vsyncadd (%p1918_p6), [#allocation5], 4294967040 }
 0x91e PF: > { %s2506_s23 = sld [smem:[#allocation7_spill]] }
 0x924   : > { %s26_s18 = sadd.s32 1, %s2506_s23  }
 0x925   : > { %p23_p7 = scmp.ge.s32.totalorder %s26_s18, 4  }
 0x927   :  { %25 = sbr.rel (!%p23_p7) target bundleno = 7 (0x7), region = 148 }
 0x92c   :  { %1664 = vsyncpa [#allocation5], 1 }
 0x92d   :  { %1666 = vsyncpa [#allocation5 + $0x1], 1 }

</bundles_post_ra>
